<compile_context>
chip_gen: v7x
topology: tpu7x:2x2x1
jax: 0.10.0
libtpu: 0.0.40
codegen_flags: <defaults>
</compile_context>

<pallas_src>
import math
import jax
import jax.numpy as jnp
from jax import lax
from jax.experimental import pallas as pl
from jax.experimental.pallas import tpu as pltpu
import numpy as np


# -----------------------------------------------------------------------------
# Pallas kernel: in-kernel token gather + interleaved bidirectional GRU
# recurrence with a merged (B, 2H) state + final fc(tanh).
# Only h-dependent work lives on the serial chain: one (2H,6H) block-diag
# matmul, one fused sigmoid, one tanh and the state update per step.
# -----------------------------------------------------------------------------
def _bigru_encoder_kernel(
    src_ref,      # SMEM (S, B) int32 token ids
    tab_f_ref,    # VMEM (V, 1, 6H): fwd input projections (+input biases) in the
                  #                  fwd gate-major slots, zeros in the bwd slots
    tab_b_ref,    # VMEM (V, 1, 6H): bwd projections in bwd slots, zeros in fwd slots
    w_h_ref,      # VMEM (2H, 6H)  block-diag hidden->gates weights, gate-major cols
    b_hn_ref,     # VMEM (1, 2H)   [b_hn_f | b_hn_b]  (n = tanh(xn + r*(W_hn h + b_hn)))
    fc_w_ref,     # VMEM (2H, D)   fc weight (input-major)
    fc_b_ref,     # VMEM (1, D)    fc bias
    out_ref,      # VMEM (S, B, 2H) encoder outputs (fwd | bwd)
    hid_ref,      # VMEM (B, D)     decoder init hidden
):
    S, B, H2 = out_ref.shape
    H = H2 // 2

    # Hoist weight/bias loads out of the (unrolled) loop.
    w_h = w_h_ref[...]      # (2H, 6H)
    b_hn = b_hn_ref[...]    # (1, 2H)

    # ---- in-kernel token gather (no h-dependence, so off the critical chain).
    # xg(t) lane layout (gate-major, H=32 => [0:128] = r,z block; [128:192] = n):
    #   [xr_f(t) | xr_b(S-1-t) | xz_f(t) | xz_b(S-1-t) | xn_f(t) | xn_b(S-1-t)]
    xg_steps = []
    for t in range(S):
        rows = []
        for b in range(B):
            tok_f = src_ref[t, b]              # scalar int32 from SMEM
            tok_b = src_ref[S - 1 - t, b]
            rows.append(tab_f_ref[tok_f] + tab_b_ref[tok_b])     # (1, 6H)
        xg_steps.append(jnp.concatenate(rows, axis=0))           # (B, 6H)

    # ---- merged bidirectional recurrence.
    # h2 = [h_f | h_b]; at iteration t the fwd half advances timestep t and the
    # bwd half advances timestep S-1-t, both through ONE block-diag matmul.
    # TODO(synk): for large S switch to lax.fori_loop(..., unroll=2..4) with a
    # VMEM scratch carry so vreg live ranges stay bounded (64 vregs).
    h2 = jnp.zeros((B, 2 * H), jnp.float32)
    h_hist = []
    for t in range(S):
        xg = xg_steps[t]
        g = jnp.dot(h2, w_h, preferred_element_type=jnp.float32)        # (B, 6H), 1 MXU pass
        rz = jax.nn.sigmoid(xg[:, 0:4 * H] + g[:, 0:4 * H])             # fused r,z (vreg 0)
        r = rz[:, 0:2 * H]
        z = rz[:, 2 * H:4 * H]
        n = jnp.tanh(xg[:, 4 * H:6 * H] + r * (g[:, 4 * H:6 * H] + b_hn))  # [128:192], aligned
        h2 = (1.0 - z) * n + z * h2
        h_hist.append(h2)

    # ---- outputs: one full-width row store per timestep, all after the loop.
    # out[t] = [h_f(t) | h_b(t)]; h_b(t) was produced at iteration S-1-t.
    for t in range(S):
        out_ref[t] = jnp.concatenate(
            [h_hist[t][:, 0:H], h_hist[S - 1 - t][:, H:2 * H]], axis=-1)

    # hidden = tanh(fc(concat(hidden[-2], hidden[-1]))); h2 already IS that concat.
    hid_ref[...] = jnp.tanh(
        jnp.dot(h2, fc_w_ref[...], preferred_element_type=jnp.float32) + fc_b_ref[...]
    )


# -----------------------------------------------------------------------------
# Parameter construction (deterministic, PyTorch-style uniform init).
# -----------------------------------------------------------------------------
def init_params(key, input_dim, emb_dim, enc_hid_dim, dec_hid_dim):
    keys = jax.random.split(key, 32)
    kit = iter(keys)
    H = enc_hid_dim

    def uni(k, shape, bound):
        return jax.random.uniform(k, shape, jnp.float32, -bound, bound)

    gru_bound = 1.0 / math.sqrt(H)

    def direction_params():
        return dict(
            w_ir=uni(next(kit), (emb_dim, H), gru_bound),
            w_iz=uni(next(kit), (emb_dim, H), gru_bound),
            w_in=uni(next(kit), (emb_dim, H), gru_bound),
            w_hr=uni(next(kit), (H, H), gru_bound),
            w_hz=uni(next(kit), (H, H), gru_bound),
            w_hn=uni(next(kit), (H, H), gru_bound),
            # b_r = b_ir + b_hr, b_z = b_iz + b_hz (combinable); b_in, b_hn kept apart
            b_r=uni(next(kit), (H,), gru_bound),
            b_z=uni(next(kit), (H,), gru_bound),
            b_in=uni(next(kit), (H,), gru_bound),
            b_hn=uni(next(kit), (H,), gru_bound),
        )

    params = dict(
        embedding=jax.random.normal(next(kit), (input_dim, emb_dim), jnp.float32),
        fwd=direction_params(),
        bwd=direction_params(),
        fc_w=uni(next(kit), (2 * H, dec_hid_dim), 1.0 / math.sqrt(2 * H)),  # (in, out)
        fc_b=uni(next(kit), (dec_hid_dim,), 1.0 / math.sqrt(2 * H)),
    )
    return params


# -----------------------------------------------------------------------------
# One-time kernel-operand preparation (hoisted out of the per-forward path):
# folds embedding + input projections into gate-major (vocab, 1, 6H) tables and
# builds the block-diagonal hidden->gates weight. Weights are static, so this
# runs once, not per call.
# -----------------------------------------------------------------------------
def prepare_kernel_params(params):
    H = params["fwd"]["w_hr"].shape[0]
    D = params["fc_w"].shape[1]
    emb = params["embedding"].astype(jnp.float32)

    # TODO(synk): nn.Dropout implemented as identity (eval mode); training-mode RNG
    # mask would prevent folding the embedding into the projection tables below.

    def direction_table(p, is_fwd):
        xr = emb @ p["w_ir"] + p["b_r"]      # (V, H)
        xz = emb @ p["w_iz"] + p["b_z"]
        xn = emb @ p["w_in"] + p["b_in"]
        zV = jnp.zeros_like(xr)
        # gate-major 6H columns: [r_f | r_b | z_f | z_b | n_f | n_b]
        blocks = [xr, zV, xz, zV, xn, zV] if is_fwd else [zV, xr, zV, xz, zV, xn]
        return jnp.concatenate(blocks, axis=1)[:, None, :]   # (V, 1, 6H)

    table_f = direction_table(params["fwd"], True)
    table_b = direction_table(params["bwd"], False)

    f, b = params["fwd"], params["bwd"]
    zH = jnp.zeros((H, H), jnp.float32)
    # Block-diagonal hidden weights with gate-major output columns:
    # row-block 0 (h_f) feeds the *_f columns, row-block 1 (h_b) the *_b columns.
    w_h = jnp.concatenate(
        [
            jnp.concatenate([f["w_hr"], zH, f["w_hz"], zH, f["w_hn"], zH], axis=1),
            jnp.concatenate([zH, b["w_hr"], zH, b["w_hz"], zH, b["w_hn"]], axis=1),
        ],
        axis=0,
    )                                                          # (2H, 6H)
    b_hn = jnp.concatenate([f["b_hn"], b["b_hn"]], axis=0).reshape(1, 2 * H)

    return dict(
        table_f=table_f,
        table_b=table_b,
        w_h=w_h,
        b_hn=b_hn,
        fc_w=params["fc_w"],                 # (2H, D), rows ordered [fwd feats | bwd feats]
        fc_b=params["fc_b"].reshape(1, D),
    )


# -----------------------------------------------------------------------------
# Wrapper: a single pallas_call — no wrapper-side gather or weight rebuilding.
# -----------------------------------------------------------------------------
def encoder_forward(src, kparams):
    S, B = src.shape
    H2 = kparams["w_h"].shape[0]          # 2H
    H = H2 // 2
    D = kparams["fc_w"].shape[1]

    smem = pl.BlockSpec(memory_space=pltpu.MemorySpace.SMEM)
    vmem = pl.BlockSpec(memory_space=pltpu.MemorySpace.VMEM)

    # TODO(synk): at production S/B (v7x: 64 MiB VMEM, 2 TensorCores) add a grid
    # over batch tiles with dimension_semantics=("parallel",) and tile the token
    # stream over S with persistent VMEM scratch for the carried state.
    outputs, hidden = pl.pallas_call(
        _bigru_encoder_kernel,
        out_shape=(
            jax.ShapeDtypeStruct((S, B, 2 * H), jnp.float32),
            jax.ShapeDtypeStruct((B, D), jnp.float32),
        ),
        in_specs=[smem, vmem, vmem, vmem, vmem, vmem, vmem],
        out_specs=(vmem, vmem),
    )(
        src.astype(jnp.int32),
        kparams["table_f"], kparams["table_b"],
        kparams["w_h"], kparams["b_hn"],
        kparams["fc_w"], kparams["fc_b"],
    )
    return outputs, hidden


# -----------------------------------------------------------------------------
# Pure-JAX reference (mirrors torch.nn.GRU(bidirectional=True) semantics).
# -----------------------------------------------------------------------------
def encoder_reference(src, params):
    embedded = jnp.take(params["embedding"], src, axis=0).astype(jnp.float32)

    def run_dir(xs, p):
        H = p["w_hr"].shape[0]

        def step(h, x):
            r = jax.nn.sigmoid(x @ p["w_ir"] + h @ p["w_hr"] + p["b_r"])
            z = jax.nn.sigmoid(x @ p["w_iz"] + h @ p["w_hz"] + p["b_z"])
            n = jnp.tanh(x @ p["w_in"] + p["b_in"] + r * (h @ p["w_hn"] + p["b_hn"]))
            h_new = (1.0 - z) * n + z * h
            return h_new, h_new

        h0 = jnp.zeros((xs.shape[1], H), jnp.float32)
        hT, ys = lax.scan(step, h0, xs)
        return ys, hT

    out_f, h_f = run_dir(embedded, params["fwd"])
    out_b_rev, h_b = run_dir(embedded[::-1], params["bwd"])
    out_b = out_b_rev[::-1]
    outputs = jnp.concatenate([out_f, out_b], axis=-1)
    hidden = jnp.tanh(jnp.concatenate([h_f, h_b], axis=-1) @ params["fc_w"] + params["fc_b"])
    return outputs, hidden


if __name__ == "__main__":
    # Small shapes consistent with the module.
    INPUT_DIM = 20      # vocab size
    EMB_DIM = 16
    ENC_HID_DIM = 32
    DEC_HID_DIM = 32
    DROPOUT = 0.5       # identity in eval mode
    SEQ_LEN = 8
    BATCH = 2

    key = jax.random.PRNGKey(0)
    pkey, skey = jax.random.split(key)
    params = init_params(pkey, INPUT_DIM, EMB_DIM, ENC_HID_DIM, DEC_HID_DIM)
    kparams = prepare_kernel_params(params)     # one-time, not per forward call
    src = jax.random.randint(skey, (SEQ_LEN, BATCH), 0, INPUT_DIM, dtype=jnp.int32)

    outputs, hidden = encoder_forward(src, kparams)
    jax.block_until_ready((outputs, hidden))

    # Sanity-check against a pure-JAX reference.
    ref_outputs, ref_hidden = encoder_reference(src, params)
    assert outputs.shape == (SEQ_LEN, BATCH, 2 * ENC_HID_DIM)
    assert hidden.shape == (BATCH, DEC_HID_DIM)
    np.testing.assert_allclose(np.asarray(outputs), np.asarray(ref_outputs), atol=2e-4, rtol=2e-4)
    np.testing.assert_allclose(np.asarray(hidden), np.asarray(ref_hidden), atol=2e-4, rtol=2e-4)

    print("KERNEL_OK")
</pallas_src>

<mosaic_0001>
module attributes {stable_mosaic.version = 11 : i64} {
  func.func @_bigru_encoder_kernel(%arg0: memref<8x2xi32, #tpu.memory_space<smem>>, %arg1: memref<20x1x192xf32, #tpu.memory_space<vmem>>, %arg2: memref<20x1x192xf32, #tpu.memory_space<vmem>>, %arg3: memref<64x192xf32, #tpu.memory_space<vmem>>, %arg4: memref<1x64xf32, #tpu.memory_space<vmem>>, %arg5: memref<64x32xf32, #tpu.memory_space<vmem>>, %arg6: memref<1x32xf32, #tpu.memory_space<vmem>>, %arg7: memref<8x2x64xf32, #tpu.memory_space<vmem>>, %arg8: memref<2x32xf32, #tpu.memory_space<vmem>>) attributes {dimension_semantics = [], scalar_prefetch = 0 : i64, scratch_operands = 0 : i64, tpu.core_type = #tpu.core_type<tc>} {
    %c0 = arith.constant 0 : index
    %c0_0 = arith.constant 0 : index
    %0 = vector.load %arg3[%c0, %c0_0] : memref<64x192xf32, #tpu.memory_space<vmem>>, vector<64x192xf32>
    %c0_1 = arith.constant 0 : index
    %c0_2 = arith.constant 0 : index
    %1 = vector.load %arg4[%c0_1, %c0_2] : memref<1x64xf32, #tpu.memory_space<vmem>>, vector<1x64xf32>
    %c0_3 = arith.constant 0 : index
    %c0_4 = arith.constant 0 : index
    %2 = memref.load %arg0[%c0_3, %c0_4] : memref<8x2xi32, #tpu.memory_space<smem>>
    %c7 = arith.constant 7 : index
    %c0_5 = arith.constant 0 : index
    %3 = memref.load %arg0[%c7, %c0_5] : memref<8x2xi32, #tpu.memory_space<smem>>
    %4 = arith.index_cast %2 : i32 to index
    %c0_6 = arith.constant 0 : index
    %c0_7 = arith.constant 0 : index
    %5 = vector.load %arg1[%4, %c0_6, %c0_7] : memref<20x1x192xf32, #tpu.memory_space<vmem>>, vector<1x1x192xf32>
    %6 = vector.shape_cast %5 : vector<1x1x192xf32> to vector<1x192xf32>
    %7 = arith.index_cast %3 : i32 to index
    %c0_8 = arith.constant 0 : index
    %c0_9 = arith.constant 0 : index
    %8 = vector.load %arg2[%7, %c0_8, %c0_9] : memref<20x1x192xf32, #tpu.memory_space<vmem>>, vector<1x1x192xf32>
    %9 = vector.shape_cast %8 : vector<1x1x192xf32> to vector<1x192xf32>
    %10 = arith.addf %6, %9 : vector<1x192xf32>
    %c0_10 = arith.constant 0 : index
    %c1 = arith.constant 1 : index
    %11 = memref.load %arg0[%c0_10, %c1] : memref<8x2xi32, #tpu.memory_space<smem>>
    %c7_11 = arith.constant 7 : index
    %c1_12 = arith.constant 1 : index
    %12 = memref.load %arg0[%c7_11, %c1_12] : memref<8x2xi32, #tpu.memory_space<smem>>
    %13 = arith.index_cast %11 : i32 to index
    %c0_13 = arith.constant 0 : index
    %c0_14 = arith.constant 0 : index
    %14 = vector.load %arg1[%13, %c0_13, %c0_14] : memref<20x1x192xf32, #tpu.memory_space<vmem>>, vector<1x1x192xf32>
    %15 = vector.shape_cast %14 : vector<1x1x192xf32> to vector<1x192xf32>
    %16 = arith.index_cast %12 : i32 to index
    %c0_15 = arith.constant 0 : index
    %c0_16 = arith.constant 0 : index
    %17 = vector.load %arg2[%16, %c0_15, %c0_16] : memref<20x1x192xf32, #tpu.memory_space<vmem>>, vector<1x1x192xf32>
    %18 = vector.shape_cast %17 : vector<1x1x192xf32> to vector<1x192xf32>
    %19 = arith.addf %15, %18 : vector<1x192xf32>
    %20 = tpu.concatenate %10, %19 in 0 : vector<1x192xf32>, vector<1x192xf32> -> vector<2x192xf32>
    %c1_17 = arith.constant 1 : index
    %c0_18 = arith.constant 0 : index
    %21 = memref.load %arg0[%c1_17, %c0_18] : memref<8x2xi32, #tpu.memory_space<smem>>
    %c6 = arith.constant 6 : index
    %c0_19 = arith.constant 0 : index
    %22 = memref.load %arg0[%c6, %c0_19] : memref<8x2xi32, #tpu.memory_space<smem>>
    %23 = arith.index_cast %21 : i32 to index
    %c0_20 = arith.constant 0 : index
    %c0_21 = arith.constant 0 : index
    %24 = vector.load %arg1[%23, %c0_20, %c0_21] : memref<20x1x192xf32, #tpu.memory_space<vmem>>, vector<1x1x192xf32>
    %25 = vector.shape_cast %24 : vector<1x1x192xf32> to vector<1x192xf32>
    %26 = arith.index_cast %22 : i32 to index
    %c0_22 = arith.constant 0 : index
    %c0_23 = arith.constant 0 : index
    %27 = vector.load %arg2[%26, %c0_22, %c0_23] : memref<20x1x192xf32, #tpu.memory_space<vmem>>, vector<1x1x192xf32>
    %28 = vector.shape_cast %27 : vector<1x1x192xf32> to vector<1x192xf32>
    %29 = arith.addf %25, %28 : vector<1x192xf32>
    %c1_24 = arith.constant 1 : index
    %c1_25 = arith.constant 1 : index
    %30 = memref.load %arg0[%c1_24, %c1_25] : memref<8x2xi32, #tpu.memory_space<smem>>
    %c6_26 = arith.constant 6 : index
    %c1_27 = arith.constant 1 : index
    %31 = memref.load %arg0[%c6_26, %c1_27] : memref<8x2xi32, #tpu.memory_space<smem>>
    %32 = arith.index_cast %30 : i32 to index
    %c0_28 = arith.constant 0 : index
    %c0_29 = arith.constant 0 : index
    %33 = vector.load %arg1[%32, %c0_28, %c0_29] : memref<20x1x192xf32, #tpu.memory_space<vmem>>, vector<1x1x192xf32>
    %34 = vector.shape_cast %33 : vector<1x1x192xf32> to vector<1x192xf32>
    %35 = arith.index_cast %31 : i32 to index
    %c0_30 = arith.constant 0 : index
    %c0_31 = arith.constant 0 : index
    %36 = vector.load %arg2[%35, %c0_30, %c0_31] : memref<20x1x192xf32, #tpu.memory_space<vmem>>, vector<1x1x192xf32>
    %37 = vector.shape_cast %36 : vector<1x1x192xf32> to vector<1x192xf32>
    %38 = arith.addf %34, %37 : vector<1x192xf32>
    %39 = tpu.concatenate %29, %38 in 0 : vector<1x192xf32>, vector<1x192xf32> -> vector<2x192xf32>
    %c2 = arith.constant 2 : index
    %c0_32 = arith.constant 0 : index
    %40 = memref.load %arg0[%c2, %c0_32] : memref<8x2xi32, #tpu.memory_space<smem>>
    %c5 = arith.constant 5 : index
    %c0_33 = arith.constant 0 : index
    %41 = memref.load %arg0[%c5, %c0_33] : memref<8x2xi32, #tpu.memory_space<smem>>
    %42 = arith.index_cast %40 : i32 to index
    %c0_34 = arith.constant 0 : index
    %c0_35 = arith.constant 0 : index
    %43 = vector.load %arg1[%42, %c0_34, %c0_35] : memref<20x1x192xf32, #tpu.memory_space<vmem>>, vector<1x1x192xf32>
    %44 = vector.shape_cast %43 : vector<1x1x192xf32> to vector<1x192xf32>
    %45 = arith.index_cast %41 : i32 to index
    %c0_36 = arith.constant 0 : index
    %c0_37 = arith.constant 0 : index
    %46 = vector.load %arg2[%45, %c0_36, %c0_37] : memref<20x1x192xf32, #tpu.memory_space<vmem>>, vector<1x1x192xf32>
    %47 = vector.shape_cast %46 : vector<1x1x192xf32> to vector<1x192xf32>
    %48 = arith.addf %44, %47 : vector<1x192xf32>
    %c2_38 = arith.constant 2 : index
    %c1_39 = arith.constant 1 : index
    %49 = memref.load %arg0[%c2_38, %c1_39] : memref<8x2xi32, #tpu.memory_space<smem>>
    %c5_40 = arith.constant 5 : index
    %c1_41 = arith.constant 1 : index
    %50 = memref.load %arg0[%c5_40, %c1_41] : memref<8x2xi32, #tpu.memory_space<smem>>
    %51 = arith.index_cast %49 : i32 to index
    %c0_42 = arith.constant 0 : index
    %c0_43 = arith.constant 0 : index
    %52 = vector.load %arg1[%51, %c0_42, %c0_43] : memref<20x1x192xf32, #tpu.memory_space<vmem>>, vector<1x1x192xf32>
    %53 = vector.shape_cast %52 : vector<1x1x192xf32> to vector<1x192xf32>
    %54 = arith.index_cast %50 : i32 to index
    %c0_44 = arith.constant 0 : index
    %c0_45 = arith.constant 0 : index
    %55 = vector.load %arg2[%54, %c0_44, %c0_45] : memref<20x1x192xf32, #tpu.memory_space<vmem>>, vector<1x1x192xf32>
    %56 = vector.shape_cast %55 : vector<1x1x192xf32> to vector<1x192xf32>
    %57 = arith.addf %53, %56 : vector<1x192xf32>
    %58 = tpu.concatenate %48, %57 in 0 : vector<1x192xf32>, vector<1x192xf32> -> vector<2x192xf32>
    %c3 = arith.constant 3 : index
    %c0_46 = arith.constant 0 : index
    %59 = memref.load %arg0[%c3, %c0_46] : memref<8x2xi32, #tpu.memory_space<smem>>
    %c4 = arith.constant 4 : index
    %c0_47 = arith.constant 0 : index
    %60 = memref.load %arg0[%c4, %c0_47] : memref<8x2xi32, #tpu.memory_space<smem>>
    %61 = arith.index_cast %59 : i32 to index
    %c0_48 = arith.constant 0 : index
    %c0_49 = arith.constant 0 : index
    %62 = vector.load %arg1[%61, %c0_48, %c0_49] : memref<20x1x192xf32, #tpu.memory_space<vmem>>, vector<1x1x192xf32>
    %63 = vector.shape_cast %62 : vector<1x1x192xf32> to vector<1x192xf32>
    %64 = arith.index_cast %60 : i32 to index
    %c0_50 = arith.constant 0 : index
    %c0_51 = arith.constant 0 : index
    %65 = vector.load %arg2[%64, %c0_50, %c0_51] : memref<20x1x192xf32, #tpu.memory_space<vmem>>, vector<1x1x192xf32>
    %66 = vector.shape_cast %65 : vector<1x1x192xf32> to vector<1x192xf32>
    %67 = arith.addf %63, %66 : vector<1x192xf32>
    %c3_52 = arith.constant 3 : index
    %c1_53 = arith.constant 1 : index
    %68 = memref.load %arg0[%c3_52, %c1_53] : memref<8x2xi32, #tpu.memory_space<smem>>
    %c4_54 = arith.constant 4 : index
    %c1_55 = arith.constant 1 : index
    %69 = memref.load %arg0[%c4_54, %c1_55] : memref<8x2xi32, #tpu.memory_space<smem>>
    %70 = arith.index_cast %68 : i32 to index
    %c0_56 = arith.constant 0 : index
    %c0_57 = arith.constant 0 : index
    %71 = vector.load %arg1[%70, %c0_56, %c0_57] : memref<20x1x192xf32, #tpu.memory_space<vmem>>, vector<1x1x192xf32>
    %72 = vector.shape_cast %71 : vector<1x1x192xf32> to vector<1x192xf32>
    %73 = arith.index_cast %69 : i32 to index
    %c0_58 = arith.constant 0 : index
    %c0_59 = arith.constant 0 : index
    %74 = vector.load %arg2[%73, %c0_58, %c0_59] : memref<20x1x192xf32, #tpu.memory_space<vmem>>, vector<1x1x192xf32>
    %75 = vector.shape_cast %74 : vector<1x1x192xf32> to vector<1x192xf32>
    %76 = arith.addf %72, %75 : vector<1x192xf32>
    %77 = tpu.concatenate %67, %76 in 0 : vector<1x192xf32>, vector<1x192xf32> -> vector<2x192xf32>
    %c4_60 = arith.constant 4 : index
    %c0_61 = arith.constant 0 : index
    %78 = memref.load %arg0[%c4_60, %c0_61] : memref<8x2xi32, #tpu.memory_space<smem>>
    %c3_62 = arith.constant 3 : index
    %c0_63 = arith.constant 0 : index
    %79 = memref.load %arg0[%c3_62, %c0_63] : memref<8x2xi32, #tpu.memory_space<smem>>
    %80 = arith.index_cast %78 : i32 to index
    %c0_64 = arith.constant 0 : index
    %c0_65 = arith.constant 0 : index
    %81 = vector.load %arg1[%80, %c0_64, %c0_65] : memref<20x1x192xf32, #tpu.memory_space<vmem>>, vector<1x1x192xf32>
    %82 = vector.shape_cast %81 : vector<1x1x192xf32> to vector<1x192xf32>
    %83 = arith.index_cast %79 : i32 to index
    %c0_66 = arith.constant 0 : index
    %c0_67 = arith.constant 0 : index
    %84 = vector.load %arg2[%83, %c0_66, %c0_67] : memref<20x1x192xf32, #tpu.memory_space<vmem>>, vector<1x1x192xf32>
    %85 = vector.shape_cast %84 : vector<1x1x192xf32> to vector<1x192xf32>
    %86 = arith.addf %82, %85 : vector<1x192xf32>
    %c4_68 = arith.constant 4 : index
    %c1_69 = arith.constant 1 : index
    %87 = memref.load %arg0[%c4_68, %c1_69] : memref<8x2xi32, #tpu.memory_space<smem>>
    %c3_70 = arith.constant 3 : index
    %c1_71 = arith.constant 1 : index
    %88 = memref.load %arg0[%c3_70, %c1_71] : memref<8x2xi32, #tpu.memory_space<smem>>
    %89 = arith.index_cast %87 : i32 to index
    %c0_72 = arith.constant 0 : index
    %c0_73 = arith.constant 0 : index
    %90 = vector.load %arg1[%89, %c0_72, %c0_73] : memref<20x1x192xf32, #tpu.memory_space<vmem>>, vector<1x1x192xf32>
    %91 = vector.shape_cast %90 : vector<1x1x192xf32> to vector<1x192xf32>
    %92 = arith.index_cast %88 : i32 to index
    %c0_74 = arith.constant 0 : index
    %c0_75 = arith.constant 0 : index
    %93 = vector.load %arg2[%92, %c0_74, %c0_75] : memref<20x1x192xf32, #tpu.memory_space<vmem>>, vector<1x1x192xf32>
    %94 = vector.shape_cast %93 : vector<1x1x192xf32> to vector<1x192xf32>
    %95 = arith.addf %91, %94 : vector<1x192xf32>
    %96 = tpu.concatenate %86, %95 in 0 : vector<1x192xf32>, vector<1x192xf32> -> vector<2x192xf32>
    %c5_76 = arith.constant 5 : index
    %c0_77 = arith.constant 0 : index
    %97 = memref.load %arg0[%c5_76, %c0_77] : memref<8x2xi32, #tpu.memory_space<smem>>
    %c2_78 = arith.constant 2 : index
    %c0_79 = arith.constant 0 : index
    %98 = memref.load %arg0[%c2_78, %c0_79] : memref<8x2xi32, #tpu.memory_space<smem>>
    %99 = arith.index_cast %97 : i32 to index
    %c0_80 = arith.constant 0 : index
    %c0_81 = arith.constant 0 : index
    %100 = vector.load %arg1[%99, %c0_80, %c0_81] : memref<20x1x192xf32, #tpu.memory_space<vmem>>, vector<1x1x192xf32>
    %101 = vector.shape_cast %100 : vector<1x1x192xf32> to vector<1x192xf32>
    %102 = arith.index_cast %98 : i32 to index
    %c0_82 = arith.constant 0 : index
    %c0_83 = arith.constant 0 : index
    %103 = vector.load %arg2[%102, %c0_82, %c0_83] : memref<20x1x192xf32, #tpu.memory_space<vmem>>, vector<1x1x192xf32>
    %104 = vector.shape_cast %103 : vector<1x1x192xf32> to vector<1x192xf32>
    %105 = arith.addf %101, %104 : vector<1x192xf32>
    %c5_84 = arith.constant 5 : index
    %c1_85 = arith.constant 1 : index
    %106 = memref.load %arg0[%c5_84, %c1_85] : memref<8x2xi32, #tpu.memory_space<smem>>
    %c2_86 = arith.constant 2 : index
    %c1_87 = arith.constant 1 : index
    %107 = memref.load %arg0[%c2_86, %c1_87] : memref<8x2xi32, #tpu.memory_space<smem>>
    %108 = arith.index_cast %106 : i32 to index
    %c0_88 = arith.constant 0 : index
    %c0_89 = arith.constant 0 : index
    %109 = vector.load %arg1[%108, %c0_88, %c0_89] : memref<20x1x192xf32, #tpu.memory_space<vmem>>, vector<1x1x192xf32>
    %110 = vector.shape_cast %109 : vector<1x1x192xf32> to vector<1x192xf32>
    %111 = arith.index_cast %107 : i32 to index
    %c0_90 = arith.constant 0 : index
    %c0_91 = arith.constant 0 : index
    %112 = vector.load %arg2[%111, %c0_90, %c0_91] : memref<20x1x192xf32, #tpu.memory_space<vmem>>, vector<1x1x192xf32>
    %113 = vector.shape_cast %112 : vector<1x1x192xf32> to vector<1x192xf32>
    %114 = arith.addf %110, %113 : vector<1x192xf32>
    %115 = tpu.concatenate %105, %114 in 0 : vector<1x192xf32>, vector<1x192xf32> -> vector<2x192xf32>
    %c6_92 = arith.constant 6 : index
    %c0_93 = arith.constant 0 : index
    %116 = memref.load %arg0[%c6_92, %c0_93] : memref<8x2xi32, #tpu.memory_space<smem>>
    %c1_94 = arith.constant 1 : index
    %c0_95 = arith.constant 0 : index
    %117 = memref.load %arg0[%c1_94, %c0_95] : memref<8x2xi32, #tpu.memory_space<smem>>
    %118 = arith.index_cast %116 : i32 to index
    %c0_96 = arith.constant 0 : index
    %c0_97 = arith.constant 0 : index
    %119 = vector.load %arg1[%118, %c0_96, %c0_97] : memref<20x1x192xf32, #tpu.memory_space<vmem>>, vector<1x1x192xf32>
    %120 = vector.shape_cast %119 : vector<1x1x192xf32> to vector<1x192xf32>
    %121 = arith.index_cast %117 : i32 to index
    %c0_98 = arith.constant 0 : index
    %c0_99 = arith.constant 0 : index
    %122 = vector.load %arg2[%121, %c0_98, %c0_99] : memref<20x1x192xf32, #tpu.memory_space<vmem>>, vector<1x1x192xf32>
    %123 = vector.shape_cast %122 : vector<1x1x192xf32> to vector<1x192xf32>
    %124 = arith.addf %120, %123 : vector<1x192xf32>
    %c6_100 = arith.constant 6 : index
    %c1_101 = arith.constant 1 : index
    %125 = memref.load %arg0[%c6_100, %c1_101] : memref<8x2xi32, #tpu.memory_space<smem>>
    %c1_102 = arith.constant 1 : index
    %c1_103 = arith.constant 1 : index
    %126 = memref.load %arg0[%c1_102, %c1_103] : memref<8x2xi32, #tpu.memory_space<smem>>
    %127 = arith.index_cast %125 : i32 to index
    %c0_104 = arith.constant 0 : index
    %c0_105 = arith.constant 0 : index
    %128 = vector.load %arg1[%127, %c0_104, %c0_105] : memref<20x1x192xf32, #tpu.memory_space<vmem>>, vector<1x1x192xf32>
    %129 = vector.shape_cast %128 : vector<1x1x192xf32> to vector<1x192xf32>
    %130 = arith.index_cast %126 : i32 to index
    %c0_106 = arith.constant 0 : index
    %c0_107 = arith.constant 0 : index
    %131 = vector.load %arg2[%130, %c0_106, %c0_107] : memref<20x1x192xf32, #tpu.memory_space<vmem>>, vector<1x1x192xf32>
    %132 = vector.shape_cast %131 : vector<1x1x192xf32> to vector<1x192xf32>
    %133 = arith.addf %129, %132 : vector<1x192xf32>
    %134 = tpu.concatenate %124, %133 in 0 : vector<1x192xf32>, vector<1x192xf32> -> vector<2x192xf32>
    %c7_108 = arith.constant 7 : index
    %c0_109 = arith.constant 0 : index
    %135 = memref.load %arg0[%c7_108, %c0_109] : memref<8x2xi32, #tpu.memory_space<smem>>
    %c0_110 = arith.constant 0 : index
    %c0_111 = arith.constant 0 : index
    %136 = memref.load %arg0[%c0_110, %c0_111] : memref<8x2xi32, #tpu.memory_space<smem>>
    %137 = arith.index_cast %135 : i32 to index
    %c0_112 = arith.constant 0 : index
    %c0_113 = arith.constant 0 : index
    %138 = vector.load %arg1[%137, %c0_112, %c0_113] : memref<20x1x192xf32, #tpu.memory_space<vmem>>, vector<1x1x192xf32>
    %139 = vector.shape_cast %138 : vector<1x1x192xf32> to vector<1x192xf32>
    %140 = arith.index_cast %136 : i32 to index
    %c0_114 = arith.constant 0 : index
    %c0_115 = arith.constant 0 : index
    %141 = vector.load %arg2[%140, %c0_114, %c0_115] : memref<20x1x192xf32, #tpu.memory_space<vmem>>, vector<1x1x192xf32>
    %142 = vector.shape_cast %141 : vector<1x1x192xf32> to vector<1x192xf32>
    %143 = arith.addf %139, %142 : vector<1x192xf32>
    %c7_116 = arith.constant 7 : index
    %c1_117 = arith.constant 1 : index
    %144 = memref.load %arg0[%c7_116, %c1_117] : memref<8x2xi32, #tpu.memory_space<smem>>
    %c0_118 = arith.constant 0 : index
    %c1_119 = arith.constant 1 : index
    %145 = memref.load %arg0[%c0_118, %c1_119] : memref<8x2xi32, #tpu.memory_space<smem>>
    %146 = arith.index_cast %144 : i32 to index
    %c0_120 = arith.constant 0 : index
    %c0_121 = arith.constant 0 : index
    %147 = vector.load %arg1[%146, %c0_120, %c0_121] : memref<20x1x192xf32, #tpu.memory_space<vmem>>, vector<1x1x192xf32>
    %148 = vector.shape_cast %147 : vector<1x1x192xf32> to vector<1x192xf32>
    %149 = arith.index_cast %145 : i32 to index
    %c0_122 = arith.constant 0 : index
    %c0_123 = arith.constant 0 : index
    %150 = vector.load %arg2[%149, %c0_122, %c0_123] : memref<20x1x192xf32, #tpu.memory_space<vmem>>, vector<1x1x192xf32>
    %151 = vector.shape_cast %150 : vector<1x1x192xf32> to vector<1x192xf32>
    %152 = arith.addf %148, %151 : vector<1x192xf32>
    %153 = tpu.concatenate %143, %152 in 0 : vector<1x192xf32>, vector<1x192xf32> -> vector<2x192xf32>
    %cst = arith.constant 0.000000e+00 : f32
    %154 = vector.broadcast %cst : f32 to vector<2x64xf32>
    %cst_124 = arith.constant dense<0.000000e+00> : vector<2x192xf32>
    %155 = tpu.matmul %154, %0, %cst_124 {dimension_numbers = #tpu.dot_dimension_numbers<[1], [0], [0], [1], [0, 0, 1, 1], [], []>} : vector<2x64xf32>, vector<64x192xf32>, vector<2x192xf32> -> vector<2x192xf32>
    %156 = vector.extract_strided_slice %20 {offsets = [0, 0], sizes = [2, 128], strides = [1, 1]} : vector<2x192xf32> to vector<2x128xf32>
    %157 = vector.extract_strided_slice %155 {offsets = [0, 0], sizes = [2, 128], strides = [1, 1]} : vector<2x192xf32> to vector<2x128xf32>
    %158 = arith.addf %156, %157 : vector<2x128xf32>
    %159 = arith.negf %158 : vector<2x128xf32>
    %160 = math.exp %159 : vector<2x128xf32>
    %cst_125 = arith.constant 1.000000e+00 : f32
    %161 = vector.broadcast %cst_125 : f32 to vector<2x128xf32>
    %162 = arith.addf %161, %160 : vector<2x128xf32>
    %163 = arith.divf %161, %162 : vector<2x128xf32>
    %164 = vector.extract_strided_slice %163 {offsets = [0, 0], sizes = [2, 64], strides = [1, 1]} : vector<2x128xf32> to vector<2x64xf32>
    %165 = vector.extract_strided_slice %163 {offsets = [0, 64], sizes = [2, 64], strides = [1, 1]} : vector<2x128xf32> to vector<2x64xf32>
    %166 = vector.extract_strided_slice %20 {offsets = [0, 128], sizes = [2, 64], strides = [1, 1]} : vector<2x192xf32> to vector<2x64xf32>
    %167 = vector.extract_strided_slice %155 {offsets = [0, 128], sizes = [2, 64], strides = [1, 1]} : vector<2x192xf32> to vector<2x64xf32>
    %168 = vector.broadcast %1 : vector<1x64xf32> to vector<2x64xf32>
    %169 = arith.addf %167, %168 : vector<2x64xf32>
    %170 = arith.mulf %164, %169 : vector<2x64xf32>
    %171 = arith.addf %166, %170 : vector<2x64xf32>
    %172 = math.tanh %171 : vector<2x64xf32>
    %cst_126 = arith.constant 1.000000e+00 : f32
    %173 = vector.broadcast %cst_126 : f32 to vector<2x64xf32>
    %174 = arith.subf %173, %165 : vector<2x64xf32>
    %175 = arith.mulf %174, %172 : vector<2x64xf32>
    %176 = arith.mulf %165, %154 : vector<2x64xf32>
    %177 = arith.addf %175, %176 : vector<2x64xf32>
    %cst_127 = arith.constant dense<0.000000e+00> : vector<2x192xf32>
    %178 = tpu.matmul %177, %0, %cst_127 {dimension_numbers = #tpu.dot_dimension_numbers<[1], [0], [0], [1], [0, 0, 1, 1], [], []>} : vector<2x64xf32>, vector<64x192xf32>, vector<2x192xf32> -> vector<2x192xf32>
    %179 = vector.extract_strided_slice %39 {offsets = [0, 0], sizes = [2, 128], strides = [1, 1]} : vector<2x192xf32> to vector<2x128xf32>
    %180 = vector.extract_strided_slice %178 {offsets = [0, 0], sizes = [2, 128], strides = [1, 1]} : vector<2x192xf32> to vector<2x128xf32>
    %181 = arith.addf %179, %180 : vector<2x128xf32>
    %182 = arith.negf %181 : vector<2x128xf32>
    %183 = math.exp %182 : vector<2x128xf32>
    %cst_128 = arith.constant 1.000000e+00 : f32
    %184 = vector.broadcast %cst_128 : f32 to vector<2x128xf32>
    %185 = arith.addf %184, %183 : vector<2x128xf32>
    %186 = arith.divf %184, %185 : vector<2x128xf32>
    %187 = vector.extract_strided_slice %186 {offsets = [0, 0], sizes = [2, 64], strides = [1, 1]} : vector<2x128xf32> to vector<2x64xf32>
    %188 = vector.extract_strided_slice %186 {offsets = [0, 64], sizes = [2, 64], strides = [1, 1]} : vector<2x128xf32> to vector<2x64xf32>
    %189 = vector.extract_strided_slice %39 {offsets = [0, 128], sizes = [2, 64], strides = [1, 1]} : vector<2x192xf32> to vector<2x64xf32>
    %190 = vector.extract_strided_slice %178 {offsets = [0, 128], sizes = [2, 64], strides = [1, 1]} : vector<2x192xf32> to vector<2x64xf32>
    %191 = vector.broadcast %1 : vector<1x64xf32> to vector<2x64xf32>
    %192 = arith.addf %190, %191 : vector<2x64xf32>
    %193 = arith.mulf %187, %192 : vector<2x64xf32>
    %194 = arith.addf %189, %193 : vector<2x64xf32>
    %195 = math.tanh %194 : vector<2x64xf32>
    %cst_129 = arith.constant 1.000000e+00 : f32
    %196 = vector.broadcast %cst_129 : f32 to vector<2x64xf32>
    %197 = arith.subf %196, %188 : vector<2x64xf32>
    %198 = arith.mulf %197, %195 : vector<2x64xf32>
    %199 = arith.mulf %188, %177 : vector<2x64xf32>
    %200 = arith.addf %198, %199 : vector<2x64xf32>
    %cst_130 = arith.constant dense<0.000000e+00> : vector<2x192xf32>
    %201 = tpu.matmul %200, %0, %cst_130 {dimension_numbers = #tpu.dot_dimension_numbers<[1], [0], [0], [1], [0, 0, 1, 1], [], []>} : vector<2x64xf32>, vector<64x192xf32>, vector<2x192xf32> -> vector<2x192xf32>
    %202 = vector.extract_strided_slice %58 {offsets = [0, 0], sizes = [2, 128], strides = [1, 1]} : vector<2x192xf32> to vector<2x128xf32>
    %203 = vector.extract_strided_slice %201 {offsets = [0, 0], sizes = [2, 128], strides = [1, 1]} : vector<2x192xf32> to vector<2x128xf32>
    %204 = arith.addf %202, %203 : vector<2x128xf32>
    %205 = arith.negf %204 : vector<2x128xf32>
    %206 = math.exp %205 : vector<2x128xf32>
    %cst_131 = arith.constant 1.000000e+00 : f32
    %207 = vector.broadcast %cst_131 : f32 to vector<2x128xf32>
    %208 = arith.addf %207, %206 : vector<2x128xf32>
    %209 = arith.divf %207, %208 : vector<2x128xf32>
    %210 = vector.extract_strided_slice %209 {offsets = [0, 0], sizes = [2, 64], strides = [1, 1]} : vector<2x128xf32> to vector<2x64xf32>
    %211 = vector.extract_strided_slice %209 {offsets = [0, 64], sizes = [2, 64], strides = [1, 1]} : vector<2x128xf32> to vector<2x64xf32>
    %212 = vector.extract_strided_slice %58 {offsets = [0, 128], sizes = [2, 64], strides = [1, 1]} : vector<2x192xf32> to vector<2x64xf32>
    %213 = vector.extract_strided_slice %201 {offsets = [0, 128], sizes = [2, 64], strides = [1, 1]} : vector<2x192xf32> to vector<2x64xf32>
    %214 = vector.broadcast %1 : vector<1x64xf32> to vector<2x64xf32>
    %215 = arith.addf %213, %214 : vector<2x64xf32>
    %216 = arith.mulf %210, %215 : vector<2x64xf32>
    %217 = arith.addf %212, %216 : vector<2x64xf32>
    %218 = math.tanh %217 : vector<2x64xf32>
    %cst_132 = arith.constant 1.000000e+00 : f32
    %219 = vector.broadcast %cst_132 : f32 to vector<2x64xf32>
    %220 = arith.subf %219, %211 : vector<2x64xf32>
    %221 = arith.mulf %220, %218 : vector<2x64xf32>
    %222 = arith.mulf %211, %200 : vector<2x64xf32>
    %223 = arith.addf %221, %222 : vector<2x64xf32>
    %cst_133 = arith.constant dense<0.000000e+00> : vector<2x192xf32>
    %224 = tpu.matmul %223, %0, %cst_133 {dimension_numbers = #tpu.dot_dimension_numbers<[1], [0], [0], [1], [0, 0, 1, 1], [], []>} : vector<2x64xf32>, vector<64x192xf32>, vector<2x192xf32> -> vector<2x192xf32>
    %225 = vector.extract_strided_slice %77 {offsets = [0, 0], sizes = [2, 128], strides = [1, 1]} : vector<2x192xf32> to vector<2x128xf32>
    %226 = vector.extract_strided_slice %224 {offsets = [0, 0], sizes = [2, 128], strides = [1, 1]} : vector<2x192xf32> to vector<2x128xf32>
    %227 = arith.addf %225, %226 : vector<2x128xf32>
    %228 = arith.negf %227 : vector<2x128xf32>
    %229 = math.exp %228 : vector<2x128xf32>
    %cst_134 = arith.constant 1.000000e+00 : f32
    %230 = vector.broadcast %cst_134 : f32 to vector<2x128xf32>
    %231 = arith.addf %230, %229 : vector<2x128xf32>
    %232 = arith.divf %230, %231 : vector<2x128xf32>
    %233 = vector.extract_strided_slice %232 {offsets = [0, 0], sizes = [2, 64], strides = [1, 1]} : vector<2x128xf32> to vector<2x64xf32>
    %234 = vector.extract_strided_slice %232 {offsets = [0, 64], sizes = [2, 64], strides = [1, 1]} : vector<2x128xf32> to vector<2x64xf32>
    %235 = vector.extract_strided_slice %77 {offsets = [0, 128], sizes = [2, 64], strides = [1, 1]} : vector<2x192xf32> to vector<2x64xf32>
    %236 = vector.extract_strided_slice %224 {offsets = [0, 128], sizes = [2, 64], strides = [1, 1]} : vector<2x192xf32> to vector<2x64xf32>
    %237 = vector.broadcast %1 : vector<1x64xf32> to vector<2x64xf32>
    %238 = arith.addf %236, %237 : vector<2x64xf32>
    %239 = arith.mulf %233, %238 : vector<2x64xf32>
    %240 = arith.addf %235, %239 : vector<2x64xf32>
    %241 = math.tanh %240 : vector<2x64xf32>
    %cst_135 = arith.constant 1.000000e+00 : f32
    %242 = vector.broadcast %cst_135 : f32 to vector<2x64xf32>
    %243 = arith.subf %242, %234 : vector<2x64xf32>
    %244 = arith.mulf %243, %241 : vector<2x64xf32>
    %245 = arith.mulf %234, %223 : vector<2x64xf32>
    %246 = arith.addf %244, %245 : vector<2x64xf32>
    %cst_136 = arith.constant dense<0.000000e+00> : vector<2x192xf32>
    %247 = tpu.matmul %246, %0, %cst_136 {dimension_numbers = #tpu.dot_dimension_numbers<[1], [0], [0], [1], [0, 0, 1, 1], [], []>} : vector<2x64xf32>, vector<64x192xf32>, vector<2x192xf32> -> vector<2x192xf32>
    %248 = vector.extract_strided_slice %96 {offsets = [0, 0], sizes = [2, 128], strides = [1, 1]} : vector<2x192xf32> to vector<2x128xf32>
    %249 = vector.extract_strided_slice %247 {offsets = [0, 0], sizes = [2, 128], strides = [1, 1]} : vector<2x192xf32> to vector<2x128xf32>
    %250 = arith.addf %248, %249 : vector<2x128xf32>
    %251 = arith.negf %250 : vector<2x128xf32>
    %252 = math.exp %251 : vector<2x128xf32>
    %cst_137 = arith.constant 1.000000e+00 : f32
    %253 = vector.broadcast %cst_137 : f32 to vector<2x128xf32>
    %254 = arith.addf %253, %252 : vector<2x128xf32>
    %255 = arith.divf %253, %254 : vector<2x128xf32>
    %256 = vector.extract_strided_slice %255 {offsets = [0, 0], sizes = [2, 64], strides = [1, 1]} : vector<2x128xf32> to vector<2x64xf32>
    %257 = vector.extract_strided_slice %255 {offsets = [0, 64], sizes = [2, 64], strides = [1, 1]} : vector<2x128xf32> to vector<2x64xf32>
    %258 = vector.extract_strided_slice %96 {offsets = [0, 128], sizes = [2, 64], strides = [1, 1]} : vector<2x192xf32> to vector<2x64xf32>
    %259 = vector.extract_strided_slice %247 {offsets = [0, 128], sizes = [2, 64], strides = [1, 1]} : vector<2x192xf32> to vector<2x64xf32>
    %260 = vector.broadcast %1 : vector<1x64xf32> to vector<2x64xf32>
    %261 = arith.addf %259, %260 : vector<2x64xf32>
    %262 = arith.mulf %256, %261 : vector<2x64xf32>
    %263 = arith.addf %258, %262 : vector<2x64xf32>
    %264 = math.tanh %263 : vector<2x64xf32>
    %cst_138 = arith.constant 1.000000e+00 : f32
    %265 = vector.broadcast %cst_138 : f32 to vector<2x64xf32>
    %266 = arith.subf %265, %257 : vector<2x64xf32>
    %267 = arith.mulf %266, %264 : vector<2x64xf32>
    %268 = arith.mulf %257, %246 : vector<2x64xf32>
    %269 = arith.addf %267, %268 : vector<2x64xf32>
    %cst_139 = arith.constant dense<0.000000e+00> : vector<2x192xf32>
    %270 = tpu.matmul %269, %0, %cst_139 {dimension_numbers = #tpu.dot_dimension_numbers<[1], [0], [0], [1], [0, 0, 1, 1], [], []>} : vector<2x64xf32>, vector<64x192xf32>, vector<2x192xf32> -> vector<2x192xf32>
    %271 = vector.extract_strided_slice %115 {offsets = [0, 0], sizes = [2, 128], strides = [1, 1]} : vector<2x192xf32> to vector<2x128xf32>
    %272 = vector.extract_strided_slice %270 {offsets = [0, 0], sizes = [2, 128], strides = [1, 1]} : vector<2x192xf32> to vector<2x128xf32>
    %273 = arith.addf %271, %272 : vector<2x128xf32>
    %274 = arith.negf %273 : vector<2x128xf32>
    %275 = math.exp %274 : vector<2x128xf32>
    %cst_140 = arith.constant 1.000000e+00 : f32
    %276 = vector.broadcast %cst_140 : f32 to vector<2x128xf32>
    %277 = arith.addf %276, %275 : vector<2x128xf32>
    %278 = arith.divf %276, %277 : vector<2x128xf32>
    %279 = vector.extract_strided_slice %278 {offsets = [0, 0], sizes = [2, 64], strides = [1, 1]} : vector<2x128xf32> to vector<2x64xf32>
    %280 = vector.extract_strided_slice %278 {offsets = [0, 64], sizes = [2, 64], strides = [1, 1]} : vector<2x128xf32> to vector<2x64xf32>
    %281 = vector.extract_strided_slice %115 {offsets = [0, 128], sizes = [2, 64], strides = [1, 1]} : vector<2x192xf32> to vector<2x64xf32>
    %282 = vector.extract_strided_slice %270 {offsets = [0, 128], sizes = [2, 64], strides = [1, 1]} : vector<2x192xf32> to vector<2x64xf32>
    %283 = vector.broadcast %1 : vector<1x64xf32> to vector<2x64xf32>
    %284 = arith.addf %282, %283 : vector<2x64xf32>
    %285 = arith.mulf %279, %284 : vector<2x64xf32>
    %286 = arith.addf %281, %285 : vector<2x64xf32>
    %287 = math.tanh %286 : vector<2x64xf32>
    %cst_141 = arith.constant 1.000000e+00 : f32
    %288 = vector.broadcast %cst_141 : f32 to vector<2x64xf32>
    %289 = arith.subf %288, %280 : vector<2x64xf32>
    %290 = arith.mulf %289, %287 : vector<2x64xf32>
    %291 = arith.mulf %280, %269 : vector<2x64xf32>
    %292 = arith.addf %290, %291 : vector<2x64xf32>
    %cst_142 = arith.constant dense<0.000000e+00> : vector<2x192xf32>
    %293 = tpu.matmul %292, %0, %cst_142 {dimension_numbers = #tpu.dot_dimension_numbers<[1], [0], [0], [1], [0, 0, 1, 1], [], []>} : vector<2x64xf32>, vector<64x192xf32>, vector<2x192xf32> -> vector<2x192xf32>
    %294 = vector.extract_strided_slice %134 {offsets = [0, 0], sizes = [2, 128], strides = [1, 1]} : vector<2x192xf32> to vector<2x128xf32>
    %295 = vector.extract_strided_slice %293 {offsets = [0, 0], sizes = [2, 128], strides = [1, 1]} : vector<2x192xf32> to vector<2x128xf32>
    %296 = arith.addf %294, %295 : vector<2x128xf32>
    %297 = arith.negf %296 : vector<2x128xf32>
    %298 = math.exp %297 : vector<2x128xf32>
    %cst_143 = arith.constant 1.000000e+00 : f32
    %299 = vector.broadcast %cst_143 : f32 to vector<2x128xf32>
    %300 = arith.addf %299, %298 : vector<2x128xf32>
    %301 = arith.divf %299, %300 : vector<2x128xf32>
    %302 = vector.extract_strided_slice %301 {offsets = [0, 0], sizes = [2, 64], strides = [1, 1]} : vector<2x128xf32> to vector<2x64xf32>
    %303 = vector.extract_strided_slice %301 {offsets = [0, 64], sizes = [2, 64], strides = [1, 1]} : vector<2x128xf32> to vector<2x64xf32>
    %304 = vector.extract_strided_slice %134 {offsets = [0, 128], sizes = [2, 64], strides = [1, 1]} : vector<2x192xf32> to vector<2x64xf32>
    %305 = vector.extract_strided_slice %293 {offsets = [0, 128], sizes = [2, 64], strides = [1, 1]} : vector<2x192xf32> to vector<2x64xf32>
    %306 = vector.broadcast %1 : vector<1x64xf32> to vector<2x64xf32>
    %307 = arith.addf %305, %306 : vector<2x64xf32>
    %308 = arith.mulf %302, %307 : vector<2x64xf32>
    %309 = arith.addf %304, %308 : vector<2x64xf32>
    %310 = math.tanh %309 : vector<2x64xf32>
    %cst_144 = arith.constant 1.000000e+00 : f32
    %311 = vector.broadcast %cst_144 : f32 to vector<2x64xf32>
    %312 = arith.subf %311, %303 : vector<2x64xf32>
    %313 = arith.mulf %312, %310 : vector<2x64xf32>
    %314 = arith.mulf %303, %292 : vector<2x64xf32>
    %315 = arith.addf %313, %314 : vector<2x64xf32>
    %cst_145 = arith.constant dense<0.000000e+00> : vector<2x192xf32>
    %316 = tpu.matmul %315, %0, %cst_145 {dimension_numbers = #tpu.dot_dimension_numbers<[1], [0], [0], [1], [0, 0, 1, 1], [], []>} : vector<2x64xf32>, vector<64x192xf32>, vector<2x192xf32> -> vector<2x192xf32>
    %317 = vector.extract_strided_slice %153 {offsets = [0, 0], sizes = [2, 128], strides = [1, 1]} : vector<2x192xf32> to vector<2x128xf32>
    %318 = vector.extract_strided_slice %316 {offsets = [0, 0], sizes = [2, 128], strides = [1, 1]} : vector<2x192xf32> to vector<2x128xf32>
    %319 = arith.addf %317, %318 : vector<2x128xf32>
    %320 = arith.negf %319 : vector<2x128xf32>
    %321 = math.exp %320 : vector<2x128xf32>
    %cst_146 = arith.constant 1.000000e+00 : f32
    %322 = vector.broadcast %cst_146 : f32 to vector<2x128xf32>
    %323 = arith.addf %322, %321 : vector<2x128xf32>
    %324 = arith.divf %322, %323 : vector<2x128xf32>
    %325 = vector.extract_strided_slice %324 {offsets = [0, 0], sizes = [2, 64], strides = [1, 1]} : vector<2x128xf32> to vector<2x64xf32>
    %326 = vector.extract_strided_slice %324 {offsets = [0, 64], sizes = [2, 64], strides = [1, 1]} : vector<2x128xf32> to vector<2x64xf32>
    %327 = vector.extract_strided_slice %153 {offsets = [0, 128], sizes = [2, 64], strides = [1, 1]} : vector<2x192xf32> to vector<2x64xf32>
    %328 = vector.extract_strided_slice %316 {offsets = [0, 128], sizes = [2, 64], strides = [1, 1]} : vector<2x192xf32> to vector<2x64xf32>
    %329 = vector.broadcast %1 : vector<1x64xf32> to vector<2x64xf32>
    %330 = arith.addf %328, %329 : vector<2x64xf32>
    %331 = arith.mulf %325, %330 : vector<2x64xf32>
    %332 = arith.addf %327, %331 : vector<2x64xf32>
    %333 = math.tanh %332 : vector<2x64xf32>
    %cst_147 = arith.constant 1.000000e+00 : f32
    %334 = vector.broadcast %cst_147 : f32 to vector<2x64xf32>
    %335 = arith.subf %334, %326 : vector<2x64xf32>
    %336 = arith.mulf %335, %333 : vector<2x64xf32>
    %337 = arith.mulf %326, %315 : vector<2x64xf32>
    %338 = arith.addf %336, %337 : vector<2x64xf32>
    %339 = vector.extract_strided_slice %177 {offsets = [0, 0], sizes = [2, 32], strides = [1, 1]} : vector<2x64xf32> to vector<2x32xf32>
    %340 = vector.extract_strided_slice %338 {offsets = [0, 32], sizes = [2, 32], strides = [1, 1]} : vector<2x64xf32> to vector<2x32xf32>
    %341 = tpu.concatenate %339, %340 in 1 : vector<2x32xf32>, vector<2x32xf32> -> vector<2x64xf32>
    %c0_148 = arith.constant 0 : index
    %c0_149 = arith.constant 0 : index
    %c0_150 = arith.constant 0 : index
    %342 = vector.load %arg7[%c0_148, %c0_149, %c0_150] : memref<8x2x64xf32, #tpu.memory_space<vmem>>, vector<1x2x64xf32>
    %343 = vector.shape_cast %342 : vector<1x2x64xf32> to vector<2x64xf32>
    %344 = vector.shape_cast %341 : vector<2x64xf32> to vector<1x2x64xf32>
    tpu.vector_store %arg7[%c0_148, %c0_149, %c0_150], %344 {strides = array<i32>} : memref<8x2x64xf32, #tpu.memory_space<vmem>>, vector<1x2x64xf32>,
    %345 = vector.extract_strided_slice %200 {offsets = [0, 0], sizes = [2, 32], strides = [1, 1]} : vector<2x64xf32> to vector<2x32xf32>
    %346 = vector.extract_strided_slice %315 {offsets = [0, 32], sizes = [2, 32], strides = [1, 1]} : vector<2x64xf32> to vector<2x32xf32>
    %347 = tpu.concatenate %345, %346 in 1 : vector<2x32xf32>, vector<2x32xf32> -> vector<2x64xf32>
    %c1_151 = arith.constant 1 : index
    %c0_152 = arith.constant 0 : index
    %c0_153 = arith.constant 0 : index
    %348 = vector.load %arg7[%c1_151, %c0_152, %c0_153] : memref<8x2x64xf32, #tpu.memory_space<vmem>>, vector<1x2x64xf32>
    %349 = vector.shape_cast %348 : vector<1x2x64xf32> to vector<2x64xf32>
    %350 = vector.shape_cast %347 : vector<2x64xf32> to vector<1x2x64xf32>
    tpu.vector_store %arg7[%c1_151, %c0_152, %c0_153], %350 {strides = array<i32>} : memref<8x2x64xf32, #tpu.memory_space<vmem>>, vector<1x2x64xf32>,
    %351 = vector.extract_strided_slice %223 {offsets = [0, 0], sizes = [2, 32], strides = [1, 1]} : vector<2x64xf32> to vector<2x32xf32>
    %352 = vector.extract_strided_slice %292 {offsets = [0, 32], sizes = [2, 32], strides = [1, 1]} : vector<2x64xf32> to vector<2x32xf32>
    %353 = tpu.concatenate %351, %352 in 1 : vector<2x32xf32>, vector<2x32xf32> -> vector<2x64xf32>
    %c2_154 = arith.constant 2 : index
    %c0_155 = arith.constant 0 : index
    %c0_156 = arith.constant 0 : index
    %354 = vector.load %arg7[%c2_154, %c0_155, %c0_156] : memref<8x2x64xf32, #tpu.memory_space<vmem>>, vector<1x2x64xf32>
    %355 = vector.shape_cast %354 : vector<1x2x64xf32> to vector<2x64xf32>
    %356 = vector.shape_cast %353 : vector<2x64xf32> to vector<1x2x64xf32>
    tpu.vector_store %arg7[%c2_154, %c0_155, %c0_156], %356 {strides = array<i32>} : memref<8x2x64xf32, #tpu.memory_space<vmem>>, vector<1x2x64xf32>,
    %357 = vector.extract_strided_slice %246 {offsets = [0, 0], sizes = [2, 32], strides = [1, 1]} : vector<2x64xf32> to vector<2x32xf32>
    %358 = vector.extract_strided_slice %269 {offsets = [0, 32], sizes = [2, 32], strides = [1, 1]} : vector<2x64xf32> to vector<2x32xf32>
    %359 = tpu.concatenate %357, %358 in 1 : vector<2x32xf32>, vector<2x32xf32> -> vector<2x64xf32>
    %c3_157 = arith.constant 3 : index
    %c0_158 = arith.constant 0 : index
    %c0_159 = arith.constant 0 : index
    %360 = vector.load %arg7[%c3_157, %c0_158, %c0_159] : memref<8x2x64xf32, #tpu.memory_space<vmem>>, vector<1x2x64xf32>
    %361 = vector.shape_cast %360 : vector<1x2x64xf32> to vector<2x64xf32>
    %362 = vector.shape_cast %359 : vector<2x64xf32> to vector<1x2x64xf32>
    tpu.vector_store %arg7[%c3_157, %c0_158, %c0_159], %362 {strides = array<i32>} : memref<8x2x64xf32, #tpu.memory_space<vmem>>, vector<1x2x64xf32>,
    %363 = vector.extract_strided_slice %269 {offsets = [0, 0], sizes = [2, 32], strides = [1, 1]} : vector<2x64xf32> to vector<2x32xf32>
    %364 = vector.extract_strided_slice %246 {offsets = [0, 32], sizes = [2, 32], strides = [1, 1]} : vector<2x64xf32> to vector<2x32xf32>
    %365 = tpu.concatenate %363, %364 in 1 : vector<2x32xf32>, vector<2x32xf32> -> vector<2x64xf32>
    %c4_160 = arith.constant 4 : index
    %c0_161 = arith.constant 0 : index
    %c0_162 = arith.constant 0 : index
    %366 = vector.load %arg7[%c4_160, %c0_161, %c0_162] : memref<8x2x64xf32, #tpu.memory_space<vmem>>, vector<1x2x64xf32>
    %367 = vector.shape_cast %366 : vector<1x2x64xf32> to vector<2x64xf32>
    %368 = vector.shape_cast %365 : vector<2x64xf32> to vector<1x2x64xf32>
    tpu.vector_store %arg7[%c4_160, %c0_161, %c0_162], %368 {strides = array<i32>} : memref<8x2x64xf32, #tpu.memory_space<vmem>>, vector<1x2x64xf32>,
    %369 = vector.extract_strided_slice %292 {offsets = [0, 0], sizes = [2, 32], strides = [1, 1]} : vector<2x64xf32> to vector<2x32xf32>
    %370 = vector.extract_strided_slice %223 {offsets = [0, 32], sizes = [2, 32], strides = [1, 1]} : vector<2x64xf32> to vector<2x32xf32>
    %371 = tpu.concatenate %369, %370 in 1 : vector<2x32xf32>, vector<2x32xf32> -> vector<2x64xf32>
    %c5_163 = arith.constant 5 : index
    %c0_164 = arith.constant 0 : index
    %c0_165 = arith.constant 0 : index
    %372 = vector.load %arg7[%c5_163, %c0_164, %c0_165] : memref<8x2x64xf32, #tpu.memory_space<vmem>>, vector<1x2x64xf32>
    %373 = vector.shape_cast %372 : vector<1x2x64xf32> to vector<2x64xf32>
    %374 = vector.shape_cast %371 : vector<2x64xf32> to vector<1x2x64xf32>
    tpu.vector_store %arg7[%c5_163, %c0_164, %c0_165], %374 {strides = array<i32>} : memref<8x2x64xf32, #tpu.memory_space<vmem>>, vector<1x2x64xf32>,
    %375 = vector.extract_strided_slice %315 {offsets = [0, 0], sizes = [2, 32], strides = [1, 1]} : vector<2x64xf32> to vector<2x32xf32>
    %376 = vector.extract_strided_slice %200 {offsets = [0, 32], sizes = [2, 32], strides = [1, 1]} : vector<2x64xf32> to vector<2x32xf32>
    %377 = tpu.concatenate %375, %376 in 1 : vector<2x32xf32>, vector<2x32xf32> -> vector<2x64xf32>
    %c6_166 = arith.constant 6 : index
    %c0_167 = arith.constant 0 : index
    %c0_168 = arith.constant 0 : index
    %378 = vector.load %arg7[%c6_166, %c0_167, %c0_168] : memref<8x2x64xf32, #tpu.memory_space<vmem>>, vector<1x2x64xf32>
    %379 = vector.shape_cast %378 : vector<1x2x64xf32> to vector<2x64xf32>
    %380 = vector.shape_cast %377 : vector<2x64xf32> to vector<1x2x64xf32>
    tpu.vector_store %arg7[%c6_166, %c0_167, %c0_168], %380 {strides = array<i32>} : memref<8x2x64xf32, #tpu.memory_space<vmem>>, vector<1x2x64xf32>,
    %381 = vector.extract_strided_slice %338 {offsets = [0, 0], sizes = [2, 32], strides = [1, 1]} : vector<2x64xf32> to vector<2x32xf32>
    %382 = vector.extract_strided_slice %177 {offsets = [0, 32], sizes = [2, 32], strides = [1, 1]} : vector<2x64xf32> to vector<2x32xf32>
    %383 = tpu.concatenate %381, %382 in 1 : vector<2x32xf32>, vector<2x32xf32> -> vector<2x64xf32>
    %c7_169 = arith.constant 7 : index
    %c0_170 = arith.constant 0 : index
    %c0_171 = arith.constant 0 : index
    %384 = vector.load %arg7[%c7_169, %c0_170, %c0_171] : memref<8x2x64xf32, #tpu.memory_space<vmem>>, vector<1x2x64xf32>
    %385 = vector.shape_cast %384 : vector<1x2x64xf32> to vector<2x64xf32>
    %386 = vector.shape_cast %383 : vector<2x64xf32> to vector<1x2x64xf32>
    tpu.vector_store %arg7[%c7_169, %c0_170, %c0_171], %386 {strides = array<i32>} : memref<8x2x64xf32, #tpu.memory_space<vmem>>, vector<1x2x64xf32>,
    %c0_172 = arith.constant 0 : index
    %c0_173 = arith.constant 0 : index
    %387 = vector.load %arg5[%c0_172, %c0_173] : memref<64x32xf32, #tpu.memory_space<vmem>>, vector<64x32xf32>
    %cst_174 = arith.constant dense<0.000000e+00> : vector<2x32xf32>
    %388 = tpu.matmul %338, %387, %cst_174 {dimension_numbers = #tpu.dot_dimension_numbers<[1], [0], [0], [1], [0, 0, 1, 1], [], []>} : vector<2x64xf32>, vector<64x32xf32>, vector<2x32xf32> -> vector<2x32xf32>
    %c0_175 = arith.constant 0 : index
    %c0_176 = arith.constant 0 : index
    %389 = vector.load %arg6[%c0_175, %c0_176] : memref<1x32xf32, #tpu.memory_space<vmem>>, vector<1x32xf32>
    %390 = vector.broadcast %389 : vector<1x32xf32> to vector<2x32xf32>
    %391 = arith.addf %388, %390 : vector<2x32xf32>
    %392 = math.tanh %391 : vector<2x32xf32>
    %c0_177 = arith.constant 0 : index
    %c0_178 = arith.constant 0 : index
    %393 = vector.load %arg8[%c0_177, %c0_178] : memref<2x32xf32, #tpu.memory_space<vmem>>, vector<2x32xf32>
    tpu.vector_store %arg8[%c0_177, %c0_178], %392 {strides = array<i32>} : memref<2x32xf32, #tpu.memory_space<vmem>>, vector<2x32xf32>,
    return
  }
}

</mosaic_0001>

<bundles_post_ra>
// kernel: tpu_custom_call.1
= control target key start
LH: loop header
LB: loop body
LE: loop exit
PB: predicated region body
PF: predicated region fallthrough
CT: control target
= control target key end

     0   :  { %s2276_s0 = inlined_call_operand.vmem [shape: s32[8,2], index: 0, kind: input, shape index: {}]   ;;  %s2277_s1 = inlined_call_operand.vmem [shape: f32[20,1,192], index: 1, kind: input, shape index: {}]   ;;  %s2278_s2 = inlined_call_operand.vmem [shape: f32[20,1,192], index: 2, kind: input, shape index: {}]   ;;  %s2279_s3 = inlined_call_operand.hbm [shape: f32[64,192], index: 3, kind: input, shape index: {}]   ;;  %s2280_s4 = inlined_call_operand.vmem [shape: f32[1,64], index: 4, kind: input, shape index: {}]   ;;  %s2281_s5 = inlined_call_operand.vmem [shape: f32[64,32], index: 5, kind: input, shape index: {}]   ;;  %s2282_s6 = inlined_call_operand.vmem [shape: f32[1,32], index: 6, kind: input, shape index: {}]   ;;  %s2283_s7 = inlined_call_operand.hbm [shape: f32[8,2,64], index: 7, kind: output, shape index: {0}]   ;;  %s2284_s8 = inlined_call_operand.hbm [shape: f32[2,32], index: 8, kind: output, shape index: {1}]  }
   0x1   :  { %2306 = sst [smem:[#allocation18_spill]] %s2281_s5 }
   0x2   :  { %2307 = sst [smem:[#allocation19_spill]] %s2282_s6 }
   0x3   :  { %2308 = sst [smem:[#allocation20_spill]] %s2283_s7 }
   0x4   :  { %2309 = sst [smem:[#allocation21_spill]] %s2284_s8 }
   0x5   :  { %14 = vsyncpa [#allocation5], 0 }
   0x6   :  { %15 = vsyncpa [#allocation3], 0 }
   0x7   :  { %16 = vsyncpa [#allocation4], 0 }
   0x8   :  { %17 = vsyncpa [#allocation9], 0  ;;  %s24_s29 = sshll.u32 %s2276_s0, 4  ;;  %s25_s29 = int_to_ptr.vmem [resolvable:$true] %s24_s29 }
   0x9   :  { %s1645_s30 = scalar_lea.vmem %s25_s29, 128  ;;  %p1650_p1 = scmp.lt.s32.totalorder %s25_s29, %s25_s29 }
   0xa   :  { %p1646_p0 = scmp.ne.s32.totalorder %s25_s29, %s1645_s30  ;;  %p1651_p2 = scmp.lt.s32.totalorder %s1645_s30, %s1645_s30 }
   0xc   :  { %p1652_p3 = por %p1651_p2, %p1650_p1 }
   0xe   :  { %p1653_p4 = pnand %p1652_p3, %p1646_p0 }
  0x10   :  { %1656 = shalt.err (!%p1653_p4)
}
  0x11   :  { %s1731_s9 = smov [#allocation2]   ;;  %s1732_s10 = smov [#allocation6]  }
  0x12   :  { %27 = dma.vmem_to_smem %s25_s29, 128, %s1731_s9, [#allocation5]  }
  0x13   :  { %s37_s11 = sshll.u32 %s1732_s10, 4  ;;  %s1657_s14 = scalar_lea.hbm %s2279_s3, 2048  ;;  %s38_s11 = int_to_ptr.vmem [resolvable:$true] %s37_s11 }
  0x14   :  { %p1658_p5 = scmp.ne.s32.totalorder %s2279_s3, %s1657_s14  ;;  %p1661_p6 = scmp.lt.u32.totalorder %s1657_s14, %s2279_s3 }
  0x16   :  { %p1663_p7 = pnand %p1661_p6, %p1658_p5 }
  0x18   :  { %1666 = shalt.err (!%p1663_p7)
}
  0x19   :  { %s1667_s18 = scalar_lea.vmem %s38_s11, 2048  ;;  %p1672_p9 = scmp.lt.s32.totalorder %s38_s11, %s38_s11 }
  0x1a   :  { %p1668_p8 = scmp.ne.s32.totalorder %s38_s11, %s1667_s18  ;;  %p1673_p10 = scmp.lt.s32.totalorder %s1667_s18, %s1667_s18 }
  0x1c   :  { %p1674_p11 = por %p1673_p10, %p1672_p9 }
  0x1e   :  { %p1675_p12 = pnand %p1674_p11, %p1668_p8 }
  0x20   :  { %1678 = shalt.err (!%p1675_p12)
}
  0x21   :  { %s1733_s19 = smov 256   ;;  %s1734_s20 = smov 16  }
  0x22   :  { %43 = dma.hbm_to_vmem [thread:$0]  %s2279_s3, 2048, %s38_s11, [#allocation3], %s1733_s19, %s1733_s19, %s1734_s20  }
  0x23   :  { %1723 = dma.done.wait [#allocation5], 128  }
  0x24   :  { %1724 = vsyncadd [#allocation5], 4294967168 }
  0x25   :  { %1725 = dma.done.wait [#allocation3], 2048  }
  0x26   :  { %1726 = vsyncadd [#allocation3], 4294965248 }
  0x27   :  { %56 = sfence }
  0x28   :  { %v58_v0 = vld [vmem:[#allocation6 + $0x8] sm:$0xff]  ;;  %v60_v1 = vld [vmem:[#allocation6 + $0x18] sm:$0xff]  ;;  %v57_v2 = vld [vmem:[#allocation6] sm:$0xff]  ;;  %v1735_v7 = vmov 0.0   ;;  %s1849_s3 = sld [smem:[#allocation2]]  ;;  %s1853_s24 = sld [smem:[#allocation2 + $0x1]]  ;;  %v93_v25 = vlaneseq }
  0x29   :  { %v1803_v3 = vpack.c.bf16 %v60_v1, %v58_v0  ;;  %v59_v4 = vld [vmem:[#allocation6 + $0x10] sm:$0xff]  ;;  %v62_v5 = vld [vmem:[#allocation6 + $0x28] sm:$0xff]  ;;  %v64_v6 = vld [vmem:[#allocation6 + $0x38] sm:$0xff]  ;;  %447 = vmatprep.mubr.f32.mxu0 %v1735_v7  ;;  %548 = vmatprep.mubr.f32.mxu1 %v1735_v7  ;;  %s1851_s23 = sld [smem:[#allocation2 + $0x380]]  ;;  %s1855_s25 = sld [smem:[#allocation2 + $0x381]]  ;;  %vm114_vm0 = vcmask 1040384  }
  0x2a   :  { %v1807_v8 = vpack.c.bf16 %v59_v4, %v57_v2  ;;  %v1809_v9 = vpack.c.bf16 %v64_v6, %v62_v5  ;;  %v61_v10 = vld [vmem:[#allocation6 + $0x20] sm:$0xff]  ;;  %v63_v11 = vld [vmem:[#allocation6 + $0x30] sm:$0xff]  ;;  %v66_v12 = vld [vmem:[#allocation6 + $0x48] sm:$0xff]  ;;  %v94_v27 = vshrl.u32 %v93_v25, 7  ;;  %s2293_s21 = smov 64   ;;  %vm379_vm1 = vcmask 523264  }
  0x2b   :  { %1444 = vmatprep.subr.bf16.mxu0 %v1803_v3  ;;  %v68_v13 = vld [vmem:[#allocation6 + $0x58] sm:$0xff]  ;;  %1460 = vmatprep.subr.bf16.mxu1 %v1803_v3  ;;  %v1814_v14 = vpack.c.bf16 %v63_v11, %v61_v10  ;;  %v65_v16 = vld [vmem:[#allocation6 + $0x40] sm:$0xff]  ;;  %v67_v17 = vld [vmem:[#allocation6 + $0x50] sm:$0xff]  ;;  %s1914_s22 = sld [smem:[#allocation2 + $0x300]]  ;;  %s1916_s30 = sld [smem:[#allocation2 + $0x81]]  ;;  %vm1149_vm2 = vcmask 261120  }
  0x2c   :  { %1446 = vmatpush1.bf16.msra.mxu0 %v1807_v8  ;;  %1462 = vmatpush1.bf16.msra.mxu1 %v1807_v8  ;;  %v1818_v15 = vpack.c.bf16 %v68_v13, %v66_v12  ;;  %v70_v18 = vld [vmem:[#allocation6 + $0x68] sm:$0xff]  ;;  %v72_v19 = vld [vmem:[#allocation6 + $0x78] sm:$0xff]  ;;  %v1822_v20 = vpack.c.bf16 %v67_v17, %v65_v16  ;;  %v69_v22 = vld [vmem:[#allocation6 + $0x60] sm:$0xff]  ;;  %v1881_v33 = vsub.s32 0, %v94_v27  ;;  %v1886_v43 = vsub.s32 1, %v94_v27  ;;  %s1918_s9 = sld [smem:[#allocation2 + $0x301]] }
  0x2d   :  { %1448 = vmatprep.subr.bf16.mxu0 %v1809_v9  ;;  %1464 = vmatprep.subr.bf16.mxu1 %v1809_v9  ;;  %v1826_v21 = vpack.c.bf16 %v72_v19, %v70_v18  ;;  %v71_v23 = vld [vmem:[#allocation6 + $0x70] sm:$0xff]  ;;  %v1891_v44 = vld [vmem:[%s2280_s4] ss:$0 sm:$0xff]  ;;  %s1912_s4 = sld [smem:[#allocation2 + $0x80]]  ;;  %s2314_s6 = smov 64   ;;  %vm1151_vm3 = vcmask 517120  }
  0x2e   :  { %v1830_v24 = vpack.c.bf16 %v71_v23, %v69_v22  ;;  %2310 = sst [smem:[#allocation14_spill]] %s1849_s3  ;;  %s2287_s26 = sshll.u32 %s1849_s3, 1  ;;  %vm1738_vm4 = vmmov 0  }
  0x2f   :  { %2311 = sst [smem:[#allocation15_spill]] %s1851_s23  ;;  %s2288_s27 = sshll.u32 %s1851_s23, 1 }
  0x30   :  { %1450 = vmatpush1.bf16.msra.mxu0 %v1814_v14  ;;  %1466 = vmatpush1.bf16.msra.mxu1 %v1814_v14  ;;  %2312 = sst [smem:[#allocation16_spill]] %s1853_s24  ;;  %s2285_s28 = sshll.u32 %s1853_s24, 1 }
  0x31   :  { %1452 = vmatprep.subr.bf16.mxu0 %v1818_v15  ;;  %1468 = vmatprep.subr.bf16.mxu1 %v1818_v15  ;;  %2313 = sst [smem:[#allocation17_spill]] %s1855_s25  ;;  %s2286_s29 = sshll.u32 %s1855_s25, 1 }
  0x32   :  { %s77_s10 = scalar_lea.vmem %s2277_s1, %s2287_s26  ;;  %s80_s13 = scalar_lea.vmem %s2278_s2, %s2288_s27 }
  0x33   :  { %s86_s16 = scalar_lea.vmem %s2277_s1, %s2285_s28  ;;  %s89_s18 = scalar_lea.vmem %s2278_s2, %s2286_s29  ;;  %v78_v26 = vld [vmem:[%s77_s10] sm:$0x3] }
  0x34   :  { %1454 = vmatpush1.bf16.msra.mxu0 %v1822_v20  ;;  %1470 = vmatpush1.bf16.msra.mxu1 %v1822_v20  ;;  %v81_v28 = vld [vmem:[%s80_s13] sm:$0x3]  ;;  %s2291_s10 = sshll.u32 %s1912_s4, 1  ;;  %s2292_s11 = sshll.u32 %s1914_s22, 1 }
  0x35   :  { %1456 = vmatprep.subr.bf16.mxu0 %v1826_v21  ;;  %1472 = vmatprep.subr.bf16.mxu1 %v1826_v21  ;;  %v87_v29 = vld [vmem:[%s86_s16] sm:$0x3]  ;;  %v82_v31 = vadd.f32 %v81_v28, %v78_v26  ;;  %s2289_s12 = sshll.u32 %s1916_s30, 1  ;;  %s2290_s13 = sshll.u32 %s1918_s9, 1 }
  0x36   :  { %v90_v30 = vld [vmem:[%s89_s18] sm:$0x3]  ;;  %s120_s16 = scalar_lea.vmem %s2277_s1, %s2291_s10  ;;  %s123_s18 = scalar_lea.vmem %s2278_s2, %s2292_s11 }
  0x37   :  { %v91_v32 = vadd.f32 %v90_v30, %v87_v29  ;;  %v96_v34 = vrot.slane %v82_v31, %v1881_v33  ;;  %v100_v45 = vrot.slane %v82_v31, %v1886_v43  ;;  %s129_s28 = scalar_lea.vmem %s2277_s1, %s2289_s12  ;;  %s132_s27 = scalar_lea.vmem %s2278_s2, %s2290_s13  ;;  %v121_v59 = vld [vmem:[%s120_s16] sm:$0x3] }
  0x38   :  { %1458 = vmatpush1.bf16.msra.mxu0 %v1830_v24  ;;  %1474 = vmatpush1.bf16.msra.mxu1 %v1830_v24  ;;  %v124_v60 = vld [vmem:[%s123_s18] sm:$0x3]  ;;  %s1966_s26 = sld [smem:[#allocation2 + $0x100]]  ;;  %s1972_s29 = sld [smem:[#allocation2 + $0x281]] }
  0x39   :  { %1476 = vmatprep.subr.bf16.mxu0 %v1803_v3  ;;  %1492 = vmatprep.subr.bf16.mxu1 %v1803_v3  ;;  %v107_v35 = vrot.slane %v91_v32, %v1881_v33  ;;  %v111_v46 = vrot.slane %v91_v32, %v1886_v43  ;;  %v130_v61 = vld [vmem:[%s129_s28] sm:$0x3]  ;;  %v125_v63 = vadd.f32 %v124_v60, %v121_v59  ;;  %s1970_s28 = sld [smem:[#allocation2 + $0x101]]  ;;  %s2022_s8 = sld [smem:[#allocation2 + $0x200]] }
  0x3a   :  { %v133_v62 = vld [vmem:[%s132_s27] sm:$0x3]  ;;  %s1968_s27 = sld [smem:[#allocation2 + $0x280]]  ;;  %s2026_s10 = sld [smem:[#allocation2 + $0x201]] }
  0x3b   :  { %448 = vmatmul.mubr.f32.vlgmr.msra.gmra.mrb[0].mxu0 %v1735_v7  ;;  %v115_v36 = vsel %vm114_vm0, %v96_v34, %v107_v35  ;;  %v116_v49 = vsel %vm114_vm0, %v100_v45, %v111_v46  ;;  %v134_v0 = vadd.f32 %v133_v62, %v130_v61  ;;  %v139_v1 = vrot.slane %v125_v63, %v1881_v33 }
  0x3c   :  { %1478 = vmatpush1.bf16.msra.mxu0 %v1807_v8  ;;  %643 = vmatprep.mubr.f32.mxu0 %v1735_v7  ;;  %v143_v16 = vrot.slane %v125_v63, %v1886_v43 }
  0x3d   :  { %1480 = vmatprep.subr.bf16.mxu0 %v1809_v9  ;;  %v150_v2 = vrot.slane %v134_v0, %v1881_v33  ;;  %v154_v17 = vrot.slane %v134_v0, %v1886_v43 }
  0x3e   :  { %s2299_s14 = sshll.u32 %s1966_s26, 1  ;;  %s2298_s0 = sshll.u32 %s1972_s29, 1 }
  0x3f   :  { %v157_v4 = vsel %vm114_vm0, %v139_v1, %v150_v2  ;;  %v158_v22 = vsel %vm114_vm0, %v143_v16, %v154_v17  ;;  %s2297_s16 = sshll.u32 %s1970_s28, 1  ;;  %s162_s19 = scalar_lea.vmem %s2277_s1, %s2299_s14 }
  0x40   :  { %1482 = vmatpush1.bf16.msra.mxu0 %v1814_v14  ;;  %s2300_s15 = sshll.u32 %s1968_s27, 1  ;;  %s174_s7 = scalar_lea.vmem %s2278_s2, %s2298_s0  ;;  %v163_v34 = vld [vmem:[%s162_s19] sm:$0x3] }
  0x41   :  { %1484 = vmatprep.subr.bf16.mxu0 %v1818_v15  ;;  %s165_s13 = scalar_lea.vmem %s2278_s2, %s2300_s15  ;;  %s1392_s12 = sshll.u32 %s2022_s8, 1 }
  0x42   :  { %v166_v35 = vld [vmem:[%s165_s13] sm:$0x3]  ;;  %s1396_s17 = sshll.u32 %s2026_s10, 1  ;;  %s207_s14 = scalar_lea.vmem %s2278_s2, %s1392_s12 }
  0x43   :  { %s216_s23 = scalar_lea.vmem %s2278_s2, %s1396_s17  ;;  %v208_v2 = vld [vmem:[%s207_s14] sm:$0x3]  ;;  %s248_s0 = scalar_lea.vmem %s2277_s1, %s1396_s17 }
  0x44   :  { %1486 = vmatpush1.bf16.msra.mxu0 %v1822_v20  ;;  %s2317_s5 = sshll.u32 %s1972_s29, 1  ;;  %s2318_s25 = sshll.u32 %s1970_s28, 1 }
  0x45   :  { %1488 = vmatprep.subr.bf16.mxu0 %v1826_v21 }
  0x48   :  { %1490 = vmatpush1.bf16.msra.mxu0 %v1830_v24 }
  0x49   :  { %1508 = vmatprep.subr.bf16.mxu0 %v1803_v3 }
 0x10e   :  { %v449_v37 = vpop.f32.mrb[0].mxu0 }
 0x10f   :  { %v454_v38 = vadd.f32 %v449_v37, %v115_v36  ;;  %v451_v39 = vpop.f32.mrb[1].mxu0  ;;  %v175_v37 = vld [vmem:[%s174_s7] sm:$0x3]  ;;  %s2020_s7 = sld [smem:[#allocation2 + $0x180]] }
 0x110   :  { %v467_v47 = vadd.f32 %v1891_v44, %v451_v39 }
 0x111   :  { %v1397_v40 = vmul.f32 -1.442695, %v454_v38  ;;  %v167_v38 = vadd.f32 %v166_v35, %v163_v34 }
 0x113   :  { %1595 = vpow2.f32 %v1397_v40  ;;  %v181_v40 = vrot.slane %v167_v38, %v1881_v33 }
 0x115   :  { %s1391_s11 = sshll.u32 %s2020_s7, 1  ;;  %s2315_s7 = sshll.u32 %s1968_s27, 1 }
 0x116   :  { %s204_s20 = scalar_lea.vmem %s2277_s1, %s1391_s11  ;;  %s245_s14 = scalar_lea.vmem %s2278_s2, %s1391_s11 }
 0x117   :  { %s277_s10 = scalar_lea.vmem %s2277_s1, %s2315_s7  ;;  %s2316_s11 = sshll.u32 %s1966_s26, 1 }
 0x118   :  { %s279_s17 = scalar_lea.vmem %s2278_s2, %s2316_s11  ;;  %s2319_s26 = sshll.u32 %s1914_s22, 1 }
 0x119   :  { %s311_s29 = scalar_lea.vmem %s2277_s1, %s2319_s26  ;;  %s2321_s7 = sshll.u32 %s1918_s9, 1 }
 0x11a   :  { %s2322_s11 = sshll.u32 %s1916_s30, 1  ;;  %s2324_s22 = sld [smem:[#allocation14_spill]] }
 0x11b   :  { %s2325_s30 = sld [smem:[#allocation17_spill]]  ;;  %s2326_s9 = sld [smem:[#allocation16_spill]] }
 0x11d   :  { %v1596_v41 = vpop.eup %1595 }
 0x11e   :  { %v458_v42 = vadd.f32 1.0, %v1596_v41 }
 0x120   :  { %1597 = vrcp.f32 %v458_v42 }
 0x121   :  { %s2329_s26 = sshll.u32 %s2325_s30, 1 }
 0x12a   :  { %v1598_v48 = vpop.eup %1597 }
 0x12b   :  { %v468_v50 = vmul.f32 %v1598_v48, %v467_v47  ;;  %v471_v53 = vsub.f32 1.0, %v1598_v48  ;;  %v477_v55 = vmul.f32 0.0, %v1598_v48 }
 0x12d   :  { %v469_v51 = vadd.f32 %v468_v50, %v116_v49 }
 0x12f   :  { %1599 = vtanh.f32 %v469_v51  ;;  %v185_v51 = vrot.slane %v167_v38, %v1886_v43 }
 0x139   :  { %v1600_v52 = vpop.eup %1599 }
 0x13a   :  { %473 = vrot.lane.b32.xlu0 %v1600_v52, %s2293_s21 }
 0x1ac   :  { %v474_v54 = vpop.permute.xlu0 %473 }
 0x1ad   :  { %v476_v56 = vmul.f32 %v474_v54, %v471_v53 }
 0x1af   :  { %v478_v57 = vadd.f32 %v477_v55, %v476_v56 }
 0x1b1   :  { %480 = vrot.lane.b32.xlu0 %v478_v57, %s2293_s21 }
 0x223   :  { %v1899_v58 = vpop.permute.xlu0 %480 }
 0x224   :  { %1399 = vmatmul.mubr.msk.f32.vlgmr.msra.gmra.mrb[0].mxu1 %vm379_vm1, %v1899_v58 }
 0x225   :  { %1494 = vmatpush1.bf16.msra.mxu1 %v1807_v8  ;;  %738 = vmatprep.mubr.f32.mxu1 %v1735_v7 }
 0x226   :  { %1496 = vmatprep.subr.bf16.mxu1 %v1809_v9 }
 0x229   :  { %1498 = vmatpush1.bf16.msra.mxu1 %v1814_v14 }
 0x22a   :  { %1500 = vmatprep.subr.bf16.mxu1 %v1818_v15 }
 0x22d   :  { %1502 = vmatpush1.bf16.msra.mxu1 %v1822_v20 }
 0x22e   :  { %1504 = vmatprep.subr.bf16.mxu1 %v1826_v21 }
 0x231   :  { %1506 = vmatpush1.bf16.msra.mxu1 %v1830_v24 }
 0x232   :  { %1524 = vmatprep.subr.bf16.mxu1 %v1803_v3 }
 0x2f7   :  { %v550_v5 = vpop.f32.mrb[0].mxu1 }
 0x2f8   :  { %v555_v6 = vadd.f32 %v550_v5, %v157_v4  ;;  %v552_v10 = vpop.f32.mrb[1].mxu1  ;;  %v217_v5 = vld [vmem:[%s216_s23] sm:$0x3]  ;;  %s243_s23 = scalar_lea.vmem %s2277_s1, %s1392_s12 }
 0x2f9   :  { %v562_v18 = vadd.f32 %v1891_v44, %v552_v10 }
 0x2fa   :  { %v1400_v11 = vmul.f32 -1.442695, %v555_v6 }
 0x2fc   :  { %1601 = vpow2.f32 %v1400_v11 }
 0x306   :  { %v1602_v12 = vpop.eup %1601 }
 0x307   :  { %v559_v13 = vadd.f32 1.0, %v1602_v12 }
 0x309   :  { %1603 = vrcp.f32 %v559_v13 }
 0x313   :  { %v1604_v19 = vpop.eup %1603 }
 0x314   :  { %v563_v23 = vmul.f32 %v1604_v19, %v562_v18  ;;  %v566_v27 = vsub.f32 1.0, %v1604_v19  ;;  %v572_v29 = vmul.f32 %v1604_v19, %v478_v57 }
 0x316   :  { %v564_v25 = vadd.f32 %v563_v23, %v158_v22 }
 0x318   :  { %1605 = vtanh.f32 %v564_v25 }
 0x322   :  { %v1606_v26 = vpop.eup %1605 }
 0x323   :  { %568 = vrot.lane.b32.xlu1 %v1606_v26, %s2293_s21 }
 0x395   :  { %v569_v28 = vpop.permute.xlu1 %568 }
 0x396   :  { %v571_v30 = vmul.f32 %v569_v28, %v566_v27 }
 0x398   :  { %v573_v31 = vadd.f32 %v572_v29, %v571_v30 }
 0x39a   :  { %575 = vrot.lane.b32.xlu1 %v573_v31, %s2293_s21  ;;  %s171_s21 = scalar_lea.vmem %s2277_s1, %s2297_s16  ;;  %s284_s16 = scalar_lea.vmem %s2278_s2, %s2318_s25 }
 0x39b   :  { %v172_v36 = vld [vmem:[%s171_s21] sm:$0x3]  ;;  %s2024_s21 = sld [smem:[#allocation2 + $0x181]]  ;;  %s2328_s25 = sshll.u32 %s2324_s22, 1 }
 0x39c   :  { %v176_v39 = vadd.f32 %v175_v37, %v172_v36 }
 0x39e   :  { %v192_v41 = vrot.slane %v176_v39, %v1881_v33  ;;  %v196_v52 = vrot.slane %v176_v39, %v1886_v43 }
 0x3a0   :  { %v199_v42 = vsel %vm114_vm0, %v181_v40, %v192_v41  ;;  %v200_v55 = vsel %vm114_vm0, %v185_v51, %v196_v52  ;;  %v244_v41 = vld [vmem:[%s243_s23] sm:$0x3] }
 0x3a1   :  { %s1395_s13 = sshll.u32 %s2024_s21, 1 }
 0x3a2   :  { %s213_s24 = scalar_lea.vmem %s2277_s1, %s1395_s13 }
 0x3a3   :  { %v214_v4 = vld [vmem:[%s213_s24] sm:$0x3]  ;;  %s282_s24 = scalar_lea.vmem %s2277_s1, %s2317_s5 }
 0x3a4   :  { %v218_v10 = vadd.f32 %v217_v5, %v214_v4 }
 0x3a6   :  { %v234_v12 = vrot.slane %v218_v10, %v1881_v33  ;;  %v238_v26 = vrot.slane %v218_v10, %v1886_v43 }
 0x40c   :  { %v1953_v32 = vpop.permute.xlu1 %575 }
 0x40d   :  { %1401 = vmatmul.mubr.msk.f32.vlgmr.msra.gmra.mrb[2].mxu0 %vm379_vm1, %v1953_v32 }
 0x40e   :  { %1510 = vmatpush1.bf16.msra.mxu0 %v1807_v8  ;;  %833 = vmatprep.mubr.f32.mxu0 %v1735_v7 }
 0x40f   :  { %1512 = vmatprep.subr.bf16.mxu0 %v1809_v9 }
 0x412   :  { %1514 = vmatpush1.bf16.msra.mxu0 %v1814_v14 }
 0x413   :  { %1516 = vmatprep.subr.bf16.mxu0 %v1818_v15 }
 0x416   :  { %1518 = vmatpush1.bf16.msra.mxu0 %v1822_v20 }
 0x417   :  { %1520 = vmatprep.subr.bf16.mxu0 %v1826_v21 }
 0x41a   :  { %1522 = vmatpush1.bf16.msra.mxu0 %v1830_v24 }
 0x41b   :  { %1540 = vmatprep.subr.bf16.mxu0 %v1803_v3 }
 0x4e0   :  { %v645_v45 = vpop.f32.mrb[2].mxu0 }
 0x4e1   :  { %v650_v46 = vadd.f32 %v645_v45, %v199_v42  ;;  %v647_v47 = vpop.f32.mrb[3].mxu0  ;;  %v246_v42 = vld [vmem:[%s245_s14] sm:$0x3] }
 0x4e2   :  { %v657_v53 = vadd.f32 %v1891_v44, %v647_v47  ;;  %v249_v45 = vld [vmem:[%s248_s0] sm:$0x3]  ;;  %v247_v47 = vadd.f32 %v246_v42, %v244_v41  ;;  %s2320_s0 = sshll.u32 %s1912_s4, 1  ;;  %s2323_s4 = sld [smem:[#allocation15_spill]] }
 0x4e3   :  { %v1402_v48 = vmul.f32 -1.442695, %v650_v46 }
 0x4e5   :  { %1607 = vpow2.f32 %v1402_v48 }
 0x4e8   :  { %s2327_s5 = sshll.u32 %s2323_s4, 1 }
 0x4ef   :  { %v1608_v49 = vpop.eup %1607 }
 0x4f0   :  { %v654_v50 = vadd.f32 1.0, %v1608_v49  ;;  %v257_v49 = vrot.slane %v247_v47, %v1881_v33 }
 0x4f2   :  { %1609 = vrcp.f32 %v654_v50 }
 0x4fc   :  { %v1610_v54 = vpop.eup %1609 }
 0x4fd   :  { %v658_v56 = vmul.f32 %v1610_v54, %v657_v53  ;;  %v661_v60 = vsub.f32 1.0, %v1610_v54  ;;  %v667_v62 = vmul.f32 %v1610_v54, %v573_v31 }
 0x4ff   :  { %v659_v57 = vadd.f32 %v658_v56, %v200_v55 }
 0x501   :  { %1611 = vtanh.f32 %v659_v57 }
 0x50b   :  { %v1612_v59 = vpop.eup %1611 }
 0x50c   :  { %663 = vrot.lane.b32.xlu0 %v1612_v59, %s2314_s6  ;;  %v261_v59 = vrot.slane %v247_v47, %v1886_v43 }
 0x57e   :  { %v664_v61 = vpop.permute.xlu0 %663 }
 0x57f   :  { %v666_v63 = vmul.f32 %v664_v61, %v661_v60 }
 0x581   :  { %v668_v0 = vadd.f32 %v667_v62, %v666_v63 }
 0x583   :  { %670 = vrot.lane.b32.xlu1 %v668_v0, %s2314_s6 }
 0x5f5   :  { %v2007_v1 = vpop.permute.xlu1 %670 }
 0x5f6   :  { %1403 = vmatmul.mubr.msk.f32.vlgmr.msra.gmra.mrb[2].mxu1 %vm379_vm1, %v2007_v1 }
 0x5f7   :  { %1526 = vmatpush1.bf16.msra.mxu1 %v1807_v8  ;;  %928 = vmatprep.mubr.f32.mxu1 %v1735_v7 }
 0x5f8   :  { %1528 = vmatprep.subr.bf16.mxu1 %v1809_v9 }
 0x5fb   :  { %1530 = vmatpush1.bf16.msra.mxu1 %v1814_v14 }
 0x5fc   :  { %1532 = vmatprep.subr.bf16.mxu1 %v1818_v15 }
 0x5ff   :  { %1534 = vmatpush1.bf16.msra.mxu1 %v1822_v20 }
 0x600   :  { %1536 = vmatprep.subr.bf16.mxu1 %v1826_v21 }
 0x603   :  { %1538 = vmatpush1.bf16.msra.mxu1 %v1830_v24 }
 0x604   :  { %1556 = vmatprep.subr.bf16.mxu1 %v1803_v3  ;;  %v205_v3 = vld [vmem:[%s204_s20] sm:$0x3]  ;;  %s250_s20 = scalar_lea.vmem %s2278_s2, %s1395_s13 }
 0x605   :  { %v209_v6 = vadd.f32 %v208_v2, %v205_v3  ;;  %v251_v46 = vld [vmem:[%s250_s20] sm:$0x3]  ;;  %s313_s20 = scalar_lea.vmem %s2278_s2, %s2320_s0  ;;  %s2330_s0 = sshll.u32 %s2326_s9, 1 }
 0x606   :  { %v252_v48 = vadd.f32 %v251_v46, %v249_v45 }
 0x607   :  { %v223_v11 = vrot.slane %v209_v6, %v1881_v33  ;;  %v227_v25 = vrot.slane %v209_v6, %v1886_v43 }
 0x608   :  { %v268_v50 = vrot.slane %v252_v48, %v1881_v33  ;;  %v272_v60 = vrot.slane %v252_v48, %v1886_v43  ;;  %v314_v48 = vld [vmem:[%s313_s20] sm:$0x3]  ;;  %s352_s20 = scalar_lea.vmem %s2278_s2, %s2330_s0 }
 0x609   :  { %v241_v13 = vsel %vm114_vm0, %v223_v11, %v234_v12  ;;  %v242_v29 = vsel %vm114_vm0, %v227_v25, %v238_v26 }
 0x60a   :  { %v275_v51 = vsel %vm114_vm0, %v257_v49, %v268_v50  ;;  %v276_v63 = vsel %vm114_vm0, %v261_v59, %v272_v60 }
 0x6c9   :  { %v740_v16 = vpop.f32.mrb[2].mxu1 }
 0x6ca   :  { %v745_v17 = vadd.f32 %v740_v16, %v241_v13  ;;  %v742_v18 = vpop.f32.mrb[3].mxu1 }
 0x6cb   :  { %v752_v27 = vadd.f32 %v1891_v44, %v742_v18 }
 0x6cc   :  { %v1404_v19 = vmul.f32 -1.442695, %v745_v17 }
 0x6ce   :  { %1613 = vpow2.f32 %v1404_v19 }
 0x6d8   :  { %v1614_v22 = vpop.eup %1613 }
 0x6d9   :  { %v749_v23 = vadd.f32 1.0, %v1614_v22 }
 0x6db   :  { %1615 = vrcp.f32 %v749_v23 }
 0x6e5   :  { %v1616_v28 = vpop.eup %1615 }
 0x6e6   :  { %v753_v30 = vmul.f32 %v1616_v28, %v752_v27  ;;  %v756_v35 = vsub.f32 1.0, %v1616_v28  ;;  %v762_v37 = vmul.f32 %v1616_v28, %v668_v0 }
 0x6e8   :  { %v754_v31 = vadd.f32 %v753_v30, %v242_v29 }
 0x6ea   :  { %1617 = vtanh.f32 %v754_v31 }
 0x6f4   :  { %v1618_v34 = vpop.eup %1617 }
 0x6f5   :  { %758 = vrot.lane.b32.xlu0 %v1618_v34, %s2314_s6 }
 0x767   :  { %v759_v36 = vpop.permute.xlu0 %758 }
 0x768   :  { %v761_v38 = vmul.f32 %v759_v36, %v756_v35 }
 0x76a   :  { %v763_v39 = vadd.f32 %v762_v37, %v761_v38 }
 0x76c   :  { %765 = vrot.lane.b32.xlu1 %v763_v39, %s2314_s6 }
 0x7de   :  { %v766_v40 = vpop.permute.xlu1 %765 }
 0x7df   :  { %1405 = vmatmul.mubr.msk.f32.vlgmr.msra.gmra.mrb[4].mxu0 %vm379_vm1, %v766_v40 }
 0x7e0   :  { %1542 = vmatpush1.bf16.msra.mxu0 %v1807_v8  ;;  %1023 = vmatprep.mubr.f32.mxu0 %v1735_v7 }
 0x7e1   :  { %1544 = vmatprep.subr.bf16.mxu0 %v1809_v9 }
 0x7e4   :  { %1546 = vmatpush1.bf16.msra.mxu0 %v1814_v14 }
 0x7e5   :  { %1548 = vmatprep.subr.bf16.mxu0 %v1818_v15 }
 0x7e8   :  { %1550 = vmatpush1.bf16.msra.mxu0 %v1822_v20 }
 0x7e9   :  { %1552 = vmatprep.subr.bf16.mxu0 %v1826_v21 }
 0x7ec   :  { %1554 = vmatpush1.bf16.msra.mxu0 %v1830_v24 }
 0x8b2   :  { %v835_v52 = vpop.f32.mrb[4].mxu0 }
 0x8b3   :  { %v840_v53 = vadd.f32 %v835_v52, %v275_v51  ;;  %v837_v54 = vpop.f32.mrb[5].mxu0 }
 0x8b4   :  { %v847_v61 = vadd.f32 %v1891_v44, %v837_v54 }
 0x8b5   :  { %v1406_v55 = vmul.f32 -1.442695, %v840_v53 }
 0x8b7   :  { %1619 = vpow2.f32 %v1406_v55 }
 0x8c1   :  { %v1620_v56 = vpop.eup %1619 }
 0x8c2   :  { %v844_v57 = vadd.f32 1.0, %v1620_v56 }
 0x8c4   :  { %1621 = vrcp.f32 %v844_v57 }
 0x8ce   :  { %v1622_v62 = vpop.eup %1621 }
 0x8cf   :  { %v848_v0 = vmul.f32 %v1622_v62, %v847_v61  ;;  %v851_v4 = vsub.f32 1.0, %v1622_v62  ;;  %v857_v6 = vmul.f32 %v1622_v62, %v763_v39 }
 0x8d1   :  { %v849_v3 = vadd.f32 %v848_v0, %v276_v63 }
 0x8d3   :  { %1623 = vtanh.f32 %v849_v3 }
 0x8dd   :  { %v1624_v2 = vpop.eup %1623 }
 0x8de   :  { %853 = vrot.lane.b32.xlu0 %v1624_v2, %s2314_s6 }
 0x950   :  { %v854_v5 = vpop.permute.xlu0 %853 }
 0x951   :  { %v856_v10 = vmul.f32 %v854_v5, %v851_v4 }
 0x953   :  { %v858_v11 = vadd.f32 %v857_v6, %v856_v10 }
 0x955   :  { %860 = vrot.lane.b32.xlu1 %v858_v11, %s2314_s6 }
 0x9c7   :  { %v861_v12 = vpop.permute.xlu1 %860 }
 0x9c8   :  { %v1165_v13 = vsel %vm1149_vm2, %v766_v40, %v861_v12  ;;  %v1168_v16 = vsel %vm1149_vm2, %v861_v12, %v766_v40  ;;  %1407 = vmatmul.mubr.msk.f32.vlgmr.msra.gmra.mrb[4].mxu1 %vm379_vm1, %v861_v12 }
 0x9c9   :  { %1167 = vst.msk [vmem:[#allocation7 + $0x6] sm:$0x3] %vm1151_vm3, %v1165_v13  ;;  %1170 = vst.msk [vmem:[#allocation7 + $0x8] sm:$0x3] %vm1151_vm3, %v1168_v16  ;;  %1558 = vmatpush1.bf16.msra.mxu1 %v1807_v8  ;;  %1118 = vmatprep.mubr.f32.mxu1 %v1735_v7  ;;  %v278_v8 = vld [vmem:[%s277_s10] sm:$0x3]  ;;  %s316_s10 = scalar_lea.vmem %s2277_s1, %s2321_s7 }
 0x9ca   :  { %1560 = vmatprep.subr.bf16.mxu1 %v1809_v9  ;;  %v280_v9 = vld [vmem:[%s279_s17] sm:$0x3]  ;;  %s318_s17 = scalar_lea.vmem %s2278_s2, %s2322_s11  ;;  %s2331_s7 = sld [smem:[#allocation18_spill]] }
 0x9cb   :  { %v317_v49 = vld [vmem:[%s316_s10] sm:$0x3] }
 0x9cc   :  { %v319_v50 = vld [vmem:[%s318_s17] sm:$0x3] }
 0x9cd   :  { %1562 = vmatpush1.bf16.msra.mxu1 %v1814_v14  ;;  %v283_v14 = vld [vmem:[%s282_s24] sm:$0x3]  ;;  %v320_v52 = vadd.f32 %v319_v50, %v317_v49  ;;  %s345_s24 = scalar_lea.vmem %s2277_s1, %s2327_s5 }
 0x9ce   :  { %1564 = vmatprep.subr.bf16.mxu1 %v1818_v15  ;;  %v285_v15 = vld [vmem:[%s284_s16] sm:$0x3]  ;;  %s347_s16 = scalar_lea.vmem %s2278_s2, %s2328_s25 }
 0x9cf   :  { %v336_v54 = vrot.slane %v320_v52, %v1881_v33  ;;  %v340_v0 = vrot.slane %v320_v52, %v1886_v43 }
 0x9d0   :  { %v1186_v49 = vld [vmem:[%s2331_s7 + $0x30] sm:$0xff] }
 0x9d1   :  { %1566 = vmatpush1.bf16.msra.mxu1 %v1822_v20  ;;  %v281_v20 = vadd.f32 %v280_v9, %v278_v8 }
 0x9d2   :  { %1568 = vmatprep.subr.bf16.mxu1 %v1826_v21  ;;  %v286_v21 = vadd.f32 %v285_v15, %v283_v14 }
 0x9d3   :  { %v295_v28 = vrot.slane %v281_v20, %v1886_v43 }
 0x9d4   :  { %v302_v17 = vrot.slane %v286_v21, %v1881_v33  ;;  %v306_v29 = vrot.slane %v286_v21, %v1886_v43 }
 0x9d5   :  { %1570 = vmatpush1.bf16.msra.mxu1 %v1830_v24  ;;  %v291_v24 = vrot.slane %v281_v20, %v1881_v33  ;;  %v348_v20 = vld [vmem:[%s347_s16] sm:$0x3] }
 0x9d6   :  { %v310_v34 = vsel %vm114_vm0, %v295_v28, %v306_v29 }
 0x9d7   :  { %v309_v18 = vsel %vm114_vm0, %v291_v24, %v302_v17  ;;  %v353_v24 = vld [vmem:[%s352_s20] sm:$0x3] }
 0xa9b   :  { %v930_v19 = vpop.f32.mrb[4].mxu1 }
 0xa9c   :  { %v935_v22 = vadd.f32 %v930_v19, %v309_v18  ;;  %v932_v23 = vpop.f32.mrb[5].mxu1 }
 0xa9d   :  { %v942_v30 = vadd.f32 %v1891_v44, %v932_v23 }
 0xa9e   :  { %v1408_v25 = vmul.f32 -1.442695, %v935_v22 }
 0xaa0   :  { %1625 = vpow2.f32 %v1408_v25 }
 0xaaa   :  { %v1626_v26 = vpop.eup %1625 }
 0xaab   :  { %v939_v27 = vadd.f32 1.0, %v1626_v26 }
 0xaad   :  { %1627 = vrcp.f32 %v939_v27 }
 0xab7   :  { %v1628_v31 = vpop.eup %1627 }
 0xab8   :  { %v943_v35 = vmul.f32 %v1628_v31, %v942_v30  ;;  %v946_v38 = vsub.f32 1.0, %v1628_v31  ;;  %v952_v40 = vmul.f32 %v1628_v31, %v858_v11 }
 0xaba   :  { %v944_v36 = vadd.f32 %v943_v35, %v310_v34 }
 0xabc   :  { %1629 = vtanh.f32 %v944_v36 }
 0xac6   :  { %v1630_v37 = vpop.eup %1629 }
 0xac7   :  { %948 = vrot.lane.b32.xlu0 %v1630_v37, %s2314_s6 }
 0xb39   :  { %v949_v39 = vpop.permute.xlu0 %948 }
 0xb3a   :  { %v951_v41 = vmul.f32 %v949_v39, %v946_v38  ;;  %v1180_v39 = vld [vmem:[%s2331_s7] sm:$0xff] }
 0xb3c   :  { %v953_v42 = vadd.f32 %v952_v40, %v951_v41  ;;  %v1181_v40 = vld [vmem:[%s2331_s7 + $0x8] sm:$0xff]  ;;  %v1737_v41 = vmov 0.0|0.0  }
 0xb3d   :  { %1571 = vmatprep.subr.bf16.mxu0 %v1737_v41 }
 0xb3e   :  { %955 = vrot.lane.b32.xlu1 %v953_v42, %s2314_s6 }
 0xbb0   :  { %v956_v45 = vpop.permute.xlu1 %955 }
 0xbb1   :  { %v1160_v46 = vsel %vm1149_vm2, %v2007_v1, %v956_v45  ;;  %v1171_v47 = vsel %vm1149_vm2, %v956_v45, %v2007_v1  ;;  %1409 = vmatmul.mubr.msk.f32.vlgmr.msra.gmra.mrb[6].mxu0 %vm379_vm1, %v956_v45  ;;  %v312_v1 = vld [vmem:[%s311_s29] sm:$0x3]  ;;  %s350_s29 = scalar_lea.vmem %s2277_s1, %s2329_s26 }
 0xbb2   :  { %1162 = vst.msk [vmem:[#allocation7 + $0x4] sm:$0x3] %vm1151_vm3, %v1160_v46  ;;  %1173 = vst.msk [vmem:[#allocation7 + $0xa] sm:$0x3] %vm1151_vm3, %v1171_v47  ;;  %v315_v51 = vadd.f32 %v314_v48, %v312_v1  ;;  %v351_v21 = vld [vmem:[%s350_s29] sm:$0x3]  ;;  %1440 = vmatprep.mubr.msk.f32.mxu0 %vm1738_vm4, %v1735_v7 }
 0xbb3   :  { %v354_v18 = vadd.f32 %v353_v24, %v351_v21  ;;  %v1184_v46 = vld [vmem:[%s2331_s7 + $0x20] sm:$0xff]  ;;  %v1185_v47 = vld [vmem:[%s2331_s7 + $0x28] sm:$0xff]  ;;  %v1187_v7 = vld [vmem:[%s2331_s7 + $0x38] sm:$0xff] }
 0xbb4   :  { %v325_v53 = vrot.slane %v315_v51, %v1881_v33  ;;  %v329_v63 = vrot.slane %v315_v51, %v1886_v43  ;;  %v1578_v1 = vpack.c.bf16 %v1185_v47, %v1184_v46  ;;  %v1581_v50 = vpack.c.bf16 %v1187_v7, %v1186_v49 }
 0xbb5   :  { %v370_v22 = vrot.slane %v354_v18, %v1881_v33  ;;  %v374_v34 = vrot.slane %v354_v18, %v1886_v43 }
 0xbb6   :  { %v343_v55 = vsel %vm114_vm0, %v325_v53, %v336_v54  ;;  %v344_v4 = vsel %vm114_vm0, %v329_v63, %v340_v0 }
 0xc84   :  { %v1025_v56 = vpop.f32.mrb[6].mxu0 }
 0xc85   :  { %v1030_v57 = vadd.f32 %v1025_v56, %v343_v55  ;;  %v1027_v59 = vpop.f32.mrb[7].mxu0 }
 0xc86   :  { %v1037_v3 = vadd.f32 %v1891_v44, %v1027_v59 }
 0xc87   :  { %v1410_v60 = vmul.f32 -1.442695, %v1030_v57 }
 0xc89   :  { %1631 = vpow2.f32 %v1410_v60 }
 0xc93   :  { %v1632_v61 = vpop.eup %1631 }
 0xc94   :  { %v1034_v62 = vadd.f32 1.0, %v1632_v61 }
 0xc96   :  { %1633 = vrcp.f32 %v1034_v62 }
 0xca0   :  { %v1634_v2 = vpop.eup %1633 }
 0xca1   :  { %v1038_v5 = vmul.f32 %v1634_v2, %v1037_v3  ;;  %v1041_v11 = vsub.f32 1.0, %v1634_v2  ;;  %v1047_v13 = vmul.f32 %v1634_v2, %v953_v42  ;;  %v1183_v42 = vld [vmem:[%s2331_s7 + $0x18] sm:$0xff] }
 0xca3   :  { %v1039_v6 = vadd.f32 %v1038_v5, %v344_v4 }
 0xca5   :  { %1635 = vtanh.f32 %v1039_v6 }
 0xcaf   :  { %v1636_v10 = vpop.eup %1635 }
 0xcb0   :  { %1043 = vrot.lane.b32.xlu0 %v1636_v10, %s2314_s6 }
 0xd22   :  { %v1044_v12 = vpop.permute.xlu0 %1043 }
 0xd23   :  { %v1046_v16 = vmul.f32 %v1044_v12, %v1041_v11 }
 0xd25   :  { %v2176_v8 = vadd.f32 %v1047_v13, %v1046_v16 }
 0xd27   :  { %1050 = vrot.lane.b32.xlu1 %v2176_v8, %s2314_s6 }
 0xd99   :  { %v1051_v9 = vpop.permute.xlu1 %1050 }
 0xd9a   :  { %v1155_v14 = vsel %vm1149_vm2, %v1953_v32, %v1051_v9  ;;  %v1174_v15 = vsel %vm1149_vm2, %v1051_v9, %v1953_v32  ;;  %1411 = vmatmul.mubr.msk.f32.vlgmr.msra.gmra.mrb[6].mxu1 %vm379_vm1, %v1051_v9  ;;  %v346_v32 = vld [vmem:[%s345_s24] sm:$0x3]  ;;  %s1739_s24 = smov [#allocation7]  }
 0xd9b   :  { %1157 = vst.msk [vmem:[#allocation7 + $0x2] sm:$0x3] %vm1151_vm3, %v1155_v14  ;;  %1176 = vst.msk [vmem:[#allocation7 + $0xc] sm:$0x3] %vm1151_vm3, %v1174_v15  ;;  %v349_v17 = vadd.f32 %v348_v20, %v346_v32  ;;  %s1275_s25 = sshll.u32 %s1739_s24, 4  ;;  %s1276_s25 = int_to_ptr.vmem [resolvable:$true] %s1275_s25 }
 0xd9c   :  { %s1679_s14 = scalar_lea.vmem %s1276_s25, 256  ;;  %p1684_p0 = scmp.lt.s32.totalorder %s1276_s25, %s1276_s25 }
 0xd9d   :  { %v359_v19 = vrot.slane %v349_v17, %v1881_v33  ;;  %v363_v31 = vrot.slane %v349_v17, %v1886_v43  ;;  %v1182_v43 = vld [vmem:[%s2331_s7 + $0x10] sm:$0xff]  ;;  %p1680_p13 = scmp.ne.s32.totalorder %s1276_s25, %s1679_s14  ;;  %p1685_p1 = scmp.lt.s32.totalorder %s1679_s14, %s1679_s14 }
 0xd9e   :  { %v1575_v45 = vpack.c.bf16 %v1183_v42, %v1182_v43 }
 0xd9f   :  { %v377_v23 = vsel %vm114_vm0, %v359_v19, %v370_v22  ;;  %v378_v37 = vsel %vm114_vm0, %v363_v31, %v374_v34  ;;  %p1686_p2 = por %p1685_p1, %p1684_p0 }
 0xda1   :  { %p1687_p3 = pnand %p1686_p2, %p1680_p13 }
 0xe6d   :  { %v1120_v25 = vpop.f32.mrb[6].mxu1 }
 0xe6e   :  { %v1125_v26 = vadd.f32 %v1120_v25, %v377_v23  ;;  %v1122_v27 = vpop.f32.mrb[7].mxu1 }
 0xe6f   :  { %v1132_v35 = vadd.f32 %v1891_v44, %v1122_v27  ;;  %v1572_v44 = vpack.c.bf16 %v1181_v40, %v1180_v39 }
 0xe70   :  { %v1412_v28 = vmul.f32 -1.442695, %v1125_v26 }
 0xe71   :  { %1573 = vmatpush3.bf16.msra.mxu0 %v1572_v44 }
 0xe72   :  { %1637 = vpow2.f32 %v1412_v28  ;;  %1574 = vmatprep.subr.bf16.mxu0 %v1737_v41 }
 0xe75   :  { %1576 = vmatpush3.bf16.msra.mxu0 %v1575_v45 }
 0xe76   :  { %1577 = vmatprep.subr.bf16.mxu0 %v1737_v41 }
 0xe79   :  { %1579 = vmatpush3.bf16.msra.mxu0 %v1578_v1 }
 0xe7a   :  { %1580 = vmatprep.subr.bf16.mxu0 %v1737_v41 }
 0xe7c   :  { %v1638_v29 = vpop.eup %1637 }
 0xe7d   :  { %v1129_v30 = vadd.f32 1.0, %v1638_v29  ;;  %1582 = vmatpush3.bf16.msra.mxu0 %v1581_v50 }
 0xe7f   :  { %1639 = vrcp.f32 %v1129_v30 }
 0xe89   :  { %v1640_v36 = vpop.eup %1639 }
 0xe8a   :  { %v1133_v33 = vmul.f32 %v1640_v36, %v1132_v35  ;;  %v1136_v51 = vsub.f32 1.0, %v1640_v36  ;;  %v1142_v53 = vmul.f32 %v1640_v36, %v2176_v8 }
 0xe8c   :  { %v1134_v38 = vadd.f32 %v1133_v33, %v378_v37 }
 0xe8e   :  { %1641 = vtanh.f32 %v1134_v38 }
 0xe98   :  { %v1642_v48 = vpop.eup %1641 }
 0xe99   :  { %1138 = vrot.lane.b32.xlu0 %v1642_v48, %s2314_s6 }
 0xf0b   :  { %v1139_v52 = vpop.permute.xlu0 %1138 }
 0xf0c   :  { %v1141_v54 = vmul.f32 %v1139_v52, %v1136_v51 }
 0xf0e   :  { %v1143_v55 = vadd.f32 %v1142_v53, %v1141_v54 }
 0xf10   :  { %1146 = vrot.lane.b32.xlu1 %v1143_v55, %s2314_s6 }
 0xf82   :  { %v1147_v56 = vpop.permute.xlu1 %1146 }
 0xf83   :  { %v1150_v57 = vsel %vm1149_vm2, %v1899_v58, %v1147_v56  ;;  %v1177_v59 = vsel %vm1149_vm2, %v1147_v56, %v1899_v58  ;;  %1441 = vmatmul.mubr.msk.f32.vlgmr.msra.gmra.mrb[8].mxu0 %vm379_vm1, %v1147_v56 }
 0xf84   :  { %1152 = vst.msk [vmem:[#allocation7] sm:$0x3] %vm1151_vm3, %v1150_v57  ;;  %1179 = vst.msk [vmem:[#allocation7 + $0xe] sm:$0x3] %vm1151_vm3, %v1177_v59 }
 0xf85   :  { %1690 = shalt.err (!%p1687_p3)
}
 0xf86   :  { %s2332_s16 = sld [smem:[#allocation20_spill]] }
 0xf8c   :  { %s1691_s26 = scalar_lea.hbm %s2332_s16, 256 }
 0xf8d   :  { %p1692_p4 = scmp.ne.s32.totalorder %s2332_s16, %s1691_s26  ;;  %p1695_p5 = scmp.lt.u32.totalorder %s1691_s26, %s2332_s16 }
 0xf8f   :  { %p1697_p6 = pnand %p1695_p5, %p1692_p4 }
 0xf91   :  { %1700 = shalt.err (!%p1697_p6)
}
 0xf92   :  { %s1740_s18 = smov 32   ;;  %s1741_s19 = smov 2   ;;  %vm1268_vm5 = vcmask 254976  }
 0xf93   :  { %1281 = dma.vmem_to_hbm [thread:$0]  %s1276_s25, 256, %s2332_s16, [#allocation4], %s1740_s18, %s1740_s18, %s1741_s19  }
 0xf94   :  { %s2333_s8 = sld [smem:[#allocation19_spill]]  ;;  %s1742_s21 = smov [#allocation8]  }
 0xf95   :  { %s1288_s10 = sshll.u32 %s1742_s21, 4  ;;  %s1289_s10 = int_to_ptr.vmem [resolvable:$true] %s1288_s10 }
 0xf96   :  { %s1701_s11 = scalar_lea.vmem %s1289_s10, 32  ;;  %p1706_p8 = scmp.lt.s32.totalorder %s1289_s10, %s1289_s10 }
 0xf97   :  { %p1702_p7 = scmp.ne.s32.totalorder %s1289_s10, %s1701_s11  ;;  %p1707_p9 = scmp.lt.s32.totalorder %s1701_s11, %s1701_s11 }
 0xf99   :  { %p1708_p10 = por %p1707_p9, %p1706_p8 }
 0xf9a   :  { %v1413_v58 = vld [vmem:[%s2333_s8] ss:$0 sm:$0xff] }
 0xf9b   :  { %p1709_p11 = pnand %p1708_p10, %p1702_p7 }
0x1056   :  { %v1263_v60 = vpop.f32.mrb[8].mxu0 }
0x1057   :  { %v1264_v61 = vadd.f32 %v1413_v58, %v1263_v60  ;;  %v1442_v62 = vpop.f32.mrb[9].mxu0 }
0x1059   :  { %1643 = vtanh.f32 %v1264_v61 }
0x1063   :  { %v1644_v63 = vpop.eup %1643 }
0x1064   :  { %1269 = vst.msk [vmem:[#allocation8] sm:$0x3] %vm1268_vm5, %v1644_v63 }
0x1065   :  { %1712 = shalt.err (!%p1709_p11)
}
0x1066   :  { %s2334_s17 = sld [smem:[#allocation21_spill]] }
0x106c   :  { %s1713_s4 = scalar_lea.hbm %s2334_s17, 32 }
0x106d   :  { %p1714_p12 = scmp.ne.s32.totalorder %s2334_s17, %s1713_s4  ;;  %p1717_p13 = scmp.lt.u32.totalorder %s1713_s4, %s2334_s17 }
0x106f   :  { %p1719_p0 = pnand %p1717_p13, %p1714_p12 }
0x1071   :  { %1722 = shalt.err (!%p1719_p0)
}
0x1072   :  { %1291 = dma.vmem_to_hbm [thread:$0]  %s1289_s10, 32, %s2334_s17, [#allocation9]  }
0x1073   :  { %1727 = dma.done.wait [#allocation4], 256  }
0x1074   :  { %1728 = vsyncadd [#allocation4], 4294967040 }
0x1075   :  { %1729 = dma.done.wait [#allocation9], 32  }
0x1076   :  { %1730 = vsyncadd [#allocation9], 4294967264 }
0x1077   :  { %1298 = vsyncpa [#allocation3], 1 }
0x1078   :  { %1299 = vsyncpa [#allocation4], 1 }
0x1079   :  { %1300 = vsyncpa [#allocation9], 1 }
0x107a   :  { %1301 = vsyncpa [#allocation5], 1 }

</bundles_post_ra>
